<compile_context>
chip_gen: v6e
topology: v6e:2x2x1
jax: 0.10.0
libtpu: 0.0.40
codegen_flags: <defaults>
</compile_context>

<pallas_src>
import functools

import jax
import jax.numpy as jnp
from jax.experimental import pallas as pl
from jax.experimental.pallas import tpu as pltpu


def _round_up(x, m):
    return ((x + m - 1) // m) * m


# 32 MiB scoped VMEM is safe on v5e/v6e (128 MiB physical) and is the full
# scoped default on v7x (64 MiB physical) — re-check before raising tiles.
_VMEM_LIMIT = 32 * 1024 * 1024


# ----------------------------------------------------------------------------
# Kernel 1: fused stem = im2col conv 3x3 s2 + ReLU6 + depthwise 3x3 + ReLU6
# ----------------------------------------------------------------------------
def _stem_kernel(cols_ref, w1_ref, b1_ref, wdw_ref, bdw_ref, o_ref, *, C):
    # cols_ref: (1, Ho, Wo*K0p)  im2col patches, lane-packed per output row
    # w1_ref:   (Wo*K0p, Wo*C)   block-diagonal stem weight
    # b1_ref:   (1, Wo*C)        stem bias tiled across W
    # wdw_ref:  (9, Wo*C)        depthwise taps tiled across W, wrap cols zeroed
    # bdw_ref:  (1, Wo*C)
    # o_ref:    (1, Ho, Wo*C)
    Ho = o_ref.shape[1]
    WC = o_ref.shape[2]

    # Stem conv: one MXU matmul whose output is already lane-packed (Ho, W*C).
    y = jnp.dot(cols_ref[0], w1_ref[...], preferred_element_type=jnp.float32)
    y = jnp.clip(y + b1_ref[...], 0.0, 6.0)                      # (Ho, WC)

    # Depthwise 3x3, stride 1, pad 1.  Vertical neighbours via sublane rolls
    # (two row selects handle the top/bottom zero padding); horizontal
    # neighbours via lane rolls — their wrap columns are already zeroed in the
    # weights, so no lane masks are needed in-kernel.
    row = jax.lax.broadcasted_iota(jnp.int32, (Ho, WC), 0)
    north = jnp.where(row >= 1, pltpu.roll(y, 1, axis=0), 0.0)       # y[h-1]
    south = jnp.where(row < Ho - 1, pltpu.roll(y, Ho - 1, axis=0), 0.0)  # y[h+1]

    w = wdw_ref[...]                                             # (9, WC)
    acc = jnp.zeros((Ho, WC), jnp.float32)
    for di, r in enumerate((north, y, south)):
        # dj = 1 (same column)
        acc = acc + r * w[3 * di + 1:3 * di + 2, :]
        # dj = 0 (west neighbour): value from lane - C
        acc = acc + pltpu.roll(r, C, axis=1) * w[3 * di:3 * di + 1, :]
        # dj = 2 (east neighbour): value from lane + C
        acc = acc + pltpu.roll(r, WC - C, axis=1) * w[3 * di + 2:3 * di + 3, :]

    o_ref[0] = jnp.clip(acc + bdw_ref[...], 0.0, 6.0).astype(o_ref.dtype)


def stem_conv_dw(cols, w1_bd, b1, wdw, bdw, C):
    """Fused stem.  cols: (N, Ho, Wo*K0p) -> (N, Ho, Wo*C) lane-packed."""
    Nb, Ho, Kw = cols.shape
    WC = w1_bd.shape[1]                      # 128 at the test size (lane-dense)
    return pl.pallas_call(
        functools.partial(_stem_kernel, C=C),
        out_shape=jax.ShapeDtypeStruct((Nb, Ho, WC), jnp.float32),
        grid=(Nb,),                          # >=2 parallel blocks for v7x
        in_specs=[
            pl.BlockSpec((1, Ho, Kw), lambda n: (n, 0, 0)),
            pl.BlockSpec((Kw, WC), lambda n: (0, 0)),
            pl.BlockSpec((1, WC), lambda n: (0, 0)),
            pl.BlockSpec((9, WC), lambda n: (0, 0)),
            pl.BlockSpec((1, WC), lambda n: (0, 0)),
        ],
        out_specs=pl.BlockSpec((1, Ho, WC), lambda n: (n, 0, 0)),
        compiler_params=pltpu.CompilerParams(
            dimension_semantics=("parallel",),
            vmem_limit_bytes=_VMEM_LIMIT),
    )(cols, w1_bd, b1, wdw, bdw)


# ----------------------------------------------------------------------------
# Kernel 2: fused tail = pw1 + pw2 + GAP + SSD head + cls/kp heads
# ----------------------------------------------------------------------------
def _tail_kernel(y_ref, w1_ref, b1_ref, w2_ref, b2_ref, w3_ref, b3_ref,
                 w4_ref, b4_ref, o_ref, acc_ref, *, hw, tile_m, masked):
    # y_ref: (1, tm, 16); weights stay fully resident (~0.8 MiB total).
    # acc_ref (VMEM scratch) accumulates the per-batch GAP sum across M tiles.
    # NOTE: correctness requires the M grid axis to stay innermost and
    # "arbitrary" (the scratch is shared across M steps of one batch).
    m = pl.program_id(1)

    @pl.when(m == 0)
    def _():
        acc_ref[...] = jnp.zeros_like(acc_ref)

    # pw1: 16 -> 32, ReLU6
    h = jnp.dot(y_ref[0], w1_ref[...], preferred_element_type=jnp.float32)
    h = jnp.clip(h + b1_ref[...], 0.0, 6.0)                       # (tm, 32)
    # pw2: 32 -> 1024 (1000 zero-padded), ReLU6
    z = jnp.dot(h, w2_ref[...], preferred_element_type=jnp.float32)
    z = jnp.clip(z + b2_ref[...], 0.0, 6.0)                       # (tm, 1024)

    # GAP partial sum as a (1, tm) @ (tm, 1024) MXU matmul (MXU has slack at
    # K=32); when M is padded, the row mask folds into the ones vector.
    if masked:
        col = jax.lax.broadcasted_iota(jnp.int32, (1, tile_m), 1) + m * tile_m
        ones = jnp.where(col < hw, 1.0, 0.0).astype(jnp.float32)
    else:
        ones = jnp.ones((1, tile_m), jnp.float32)
    acc_ref[...] += jnp.dot(ones, z, preferred_element_type=jnp.float32)

    @pl.when(m == pl.num_programs(1) - 1)
    def _():
        feat = acc_ref[...] * (1.0 / hw)                          # (1, 1024)
        # SSDhead(1000, 128) + ReLU (contraction zero-padded to 1024)
        s = jnp.dot(feat, w3_ref[...], preferred_element_type=jnp.float32)
        s = jnp.maximum(s + b3_ref[...], 0.0)                     # (1, 128)
        # fused ClassificationBlock(128,2) + KeypointBlock(128) -> 128 lanes
        o = jnp.dot(s, w4_ref[...], preferred_element_type=jnp.float32)
        o_ref[0] = (o + b4_ref[...]).astype(o_ref.dtype)          # (1, 128)


def fused_tail(y, prep, tile_m=512):
    """y: (N, H*W, 16) lane-packed backbone activations -> (N, 128) heads."""
    Nb, HW, Cin = y.shape
    Nout = prep["pw2_w"].shape[1]                 # 1024
    Nhead = prep["head_w"].shape[1]               # 128
    tm = min(tile_m, _round_up(HW, 8))
    HWp = _round_up(HW, tm)
    y_p = y if HWp == HW else jnp.pad(y, ((0, 0), (0, HWp - HW), (0, 0)))
    masked = HWp != HW                            # explicit gate for row mask

    out = pl.pallas_call(
        functools.partial(_tail_kernel, hw=HW, tile_m=tm, masked=masked),
        out_shape=jax.ShapeDtypeStruct((Nb, 1, Nhead), jnp.float32),
        grid=(Nb, HWp // tm),
        in_specs=[
            pl.BlockSpec((1, tm, Cin), lambda n, m: (n, m, 0)),
            pl.BlockSpec(prep["pw1_w"].shape, lambda n, m: (0, 0)),
            pl.BlockSpec(prep["pw1_b"].shape, lambda n, m: (0, 0)),
            pl.BlockSpec(prep["pw2_w"].shape, lambda n, m: (0, 0)),
            pl.BlockSpec(prep["pw2_b"].shape, lambda n, m: (0, 0)),
            pl.BlockSpec(prep["ssd_w"].shape, lambda n, m: (0, 0)),
            pl.BlockSpec(prep["ssd_b"].shape, lambda n, m: (0, 0)),
            pl.BlockSpec(prep["head_w"].shape, lambda n, m: (0, 0)),
            pl.BlockSpec(prep["head_b"].shape, lambda n, m: (0, 0)),
        ],
        out_specs=pl.BlockSpec((1, 1, Nhead), lambda n, m: (n, 0, 0)),
        scratch_shapes=[pltpu.VMEM((1, Nout), jnp.float32)],
        compiler_params=pltpu.CompilerParams(
            # batch parallel (megacore), M innermost + arbitrary (scratch acc)
            dimension_semantics=("parallel", "arbitrary"),
            vmem_limit_bytes=_VMEM_LIMIT),
    )(y_p, prep["pw1_w"], prep["pw1_b"], prep["pw2_w"], prep["pw2_b"],
      prep["ssd_w"], prep["ssd_b"], prep["head_w"], prep["head_b"])
    return out.reshape(Nb, Nhead)


# ----------------------------------------------------------------------------
# Glue: im2col for the 3x3 stride-2 stem conv (3 input channels only).
# TODO(synk): at real image resolutions replace this JAX-level im2col with
# in-kernel shifted-row loads; at 16x16x3 its HBM cost is negligible.
# ----------------------------------------------------------------------------
def im2col_rows(x, K0p):
    """Returns (N, Ho, Wo*K0p) patches with k zero-padded to K0p per column."""
    N, H, W, C = x.shape
    Ho = (H + 2 - 3) // 2 + 1
    Wo = (W + 2 - 3) // 2 + 1
    xp = jnp.pad(x, ((0, 0), (1, 1), (1, 1), (0, 0)))
    cols = []
    for di in range(3):
        for dj in range(3):
            cols.append(xp[:, di:di + Ho * 2:2, dj:dj + Wo * 2:2, :])
    patches = jnp.stack(cols, axis=3)                       # (N, Ho, Wo, 9, C)
    patches = patches.reshape(N, Ho, Wo, 9 * C)
    patches = jnp.pad(patches, ((0, 0), (0, 0), (0, 0), (0, K0p - 9 * C)))
    return patches.reshape(N, Ho, Wo * K0p), Ho, Wo


# ----------------------------------------------------------------------------
# Deterministic parameter init (synthetic, mirrors constructor channel sizes)
# ----------------------------------------------------------------------------
def init_params(key):
    keys = jax.random.split(key, 8)

    def w(k, shape, scale):
        return jax.random.normal(k, shape, jnp.float32) * scale

    return {
        # Backbone (MobileNetV2-style stem + block, ending in 1000 features)
        "conv1_w": w(keys[0], (3, 3, 3, 16), 0.10),     # 3x3 s2, 3 -> 16
        "conv1_b": jnp.zeros((16,), jnp.float32),
        "dw_w":    w(keys[1], (3, 3, 16), 0.10),        # depthwise 3x3
        "dw_b":    jnp.zeros((16,), jnp.float32),
        "pw1_w":   w(keys[2], (16, 32), 0.10),          # pointwise 16 -> 32
        "pw1_b":   jnp.zeros((32,), jnp.float32),
        "pw2_w":   w(keys[3], (32, 1000), 0.05),        # pointwise 32 -> 1000
        "pw2_b":   jnp.zeros((1000,), jnp.float32),
        # SSDhead(1000, 128)
        "ssd_w":   w(keys[4], (1000, 128), 0.03),
        "ssd_b":   jnp.zeros((128,), jnp.float32),
        # ClassificationBlock(128, 2)
        "cls_w":   w(keys[5], (128, 2), 0.10),
        "cls_b":   jnp.zeros((2,), jnp.float32),
        # KeypointBlock(128) -> 4 keypoints x (x, y) = 8 outputs
        "kp_w":    w(keys[6], (128, 8), 0.10),
        "kp_b":    jnp.zeros((8,), jnp.float32),
    }


# ----------------------------------------------------------------------------
# One-time weight preprocessing (hoisted out of the jitted forward)
# ----------------------------------------------------------------------------
def prepare_params(params, H, W):
    C = params["conv1_w"].shape[-1]              # 16 depthwise channels
    K0 = 3 * 3 * params["conv1_w"].shape[2]      # 27
    K0p = _round_up(K0, 8)                       # 32 (sublane-aligned)
    Ho = (H + 2 - 3) // 2 + 1
    Wo = (W + 2 - 3) // 2 + 1
    WC = Wo * C                                  # 128 at the test size

    # Stem conv as a block-diagonal weight: the matmul output lands directly
    # in the lane-packed (Ho, Wo*C) layout the depthwise taps consume.
    w1 = params["conv1_w"].reshape(K0, C)
    w1 = jnp.pad(w1, ((0, K0p - K0), (0, 0)))                    # (32, 16)
    w1_bd = jnp.kron(jnp.eye(Wo, dtype=jnp.float32), w1)         # (Wo*32, Wo*16)
    b1 = jnp.tile(params["conv1_b"], Wo).reshape(1, WC)

    # Depthwise taps tiled across W; fold the west/east boundary masks into
    # the weights (zero the wrap columns) so the kernel needs no lane masks.
    wdw = jnp.tile(params["dw_w"].reshape(3, 3, 1, C),
                   (1, 1, Wo, 1)).reshape(9, WC)
    wdw = wdw.at[0::3, :C].set(0.0)              # dj=0 (west) taps, col 0
    wdw = wdw.at[2::3, WC - C:].set(0.0)         # dj=2 (east) taps, col W-1
    bdw = jnp.tile(params["dw_b"], Wo).reshape(1, WC)

    # Tail: pw2 output padded 1000 -> 1024 (zero weight & bias keep the padded
    # columns exactly 0 through ReLU6/GAP), SSD contraction padded to match,
    # cls+kp heads fused and padded to 128 lane-dense output columns.
    Cout = params["pw2_w"].shape[1]
    Cp = _round_up(Cout, 128)
    pw2_w = jnp.pad(params["pw2_w"], ((0, 0), (0, Cp - Cout)))
    pw2_b = jnp.pad(params["pw2_b"], (0, Cp - Cout)).reshape(1, Cp)
    ssd_w = jnp.pad(params["ssd_w"], ((0, Cp - Cout), (0, 0)))
    ssd_b = params["ssd_b"].reshape(1, -1)
    n_head = params["cls_w"].shape[1] + params["kp_w"].shape[1]
    head_w = jnp.concatenate([params["cls_w"], params["kp_w"]], axis=1)
    head_w = jnp.pad(head_w, ((0, 0), (0, 128 - n_head)))
    head_b = jnp.pad(jnp.concatenate([params["cls_b"], params["kp_b"]]),
                     (0, 128 - n_head)).reshape(1, 128)

    return {
        "w1_bd": w1_bd, "b1": b1, "wdw": wdw, "bdw": bdw,
        "pw1_w": params["pw1_w"], "pw1_b": params["pw1_b"].reshape(1, -1),
        "pw2_w": pw2_w, "pw2_b": pw2_b,
        "ssd_w": ssd_w, "ssd_b": ssd_b,
        "head_w": head_w, "head_b": head_b,
    }


# ----------------------------------------------------------------------------
# Forward pass (matches MobileNetSSDv2.forward structure)
# ----------------------------------------------------------------------------
def mobilenet_ssd_v2_forward(prep, x_nchw, *, n_cls=2, n_kp=8):
    x = jnp.transpose(x_nchw, (0, 2, 3, 1)).astype(jnp.float32)   # NCHW->NHWC
    Nb, H, W, _ = x.shape
    Ho = (H + 2 - 3) // 2 + 1
    Wo = (W + 2 - 3) // 2 + 1
    C = prep["pw1_w"].shape[0]                   # 16
    K0p = prep["w1_bd"].shape[0] // Wo           # 32

    # --- Backbone stem (fused conv1 + depthwise, one kernel) ---
    cols, Ho, Wo = im2col_rows(x, K0p)           # (N, Ho, Wo*32)
    y = stem_conv_dw(cols, prep["w1_bd"], prep["b1"],
                     prep["wdw"], prep["bdw"], C)        # (N, Ho, Wo*16)
    # layout-preserving reshape to (N, H*W, 16) rows for the tail kernel
    y = y.reshape(Nb, Ho * Wo, C)

    # --- Backbone tail + SSDhead + flatten + cls/kp heads (one kernel) ---
    heads = fused_tail(y, prep)                  # (N, 128); first 10 valid

    classification_out = heads[:, :n_cls]
    keypoint_out = heads[:, n_cls:n_cls + n_kp]
    return classification_out, keypoint_out


if __name__ == "__main__":
    key = jax.random.PRNGKey(0)
    k_param, k_input = jax.random.split(key)
    params = init_params(k_param)

    # small image batch consistent with an image-detection forward pass
    x = jax.random.normal(k_input, (2, 3, 16, 16), jnp.float32)    # NCHW

    # one-time weight padding / tiling / fusion (outside the jitted forward)
    prep = prepare_params(params, H=16, W=16)
    prep = jax.device_put(prep)

    fwd = jax.jit(mobilenet_ssd_v2_forward)
    cls_out, kp_out = fwd(prep, x)
    jax.block_until_ready((cls_out, kp_out))

    assert cls_out.shape == (2, 2)
    assert kp_out.shape == (2, 8)
    print("KERNEL_OK")
</pallas_src>

<mosaic_0001>
module attributes {stable_mosaic.version = 11 : i64} {
  func.func @_stem_kernel(%arg0: i32, %arg1: memref<1x8x256xf32, #tpu.memory_space<vmem>>, %arg2: memref<256x128xf32, #tpu.memory_space<vmem>>, %arg3: memref<1x128xf32, #tpu.memory_space<vmem>>, %arg4: memref<9x128xf32, #tpu.memory_space<vmem>>, %arg5: memref<1x128xf32, #tpu.memory_space<vmem>>, %arg6: memref<1x8x128xf32, #tpu.memory_space<vmem>>) attributes {dimension_semantics = [#tpu.dimension_semantics<parallel>], iteration_bounds = array<i64: 2>, scalar_prefetch = 0 : i64, scratch_operands = 0 : i64, tpu.core_type = #tpu.core_type<tc>, window_params = [{transform_indices = @transform_0, window_bounds = array<i64: 1, 8, 256>}, {pipeline_mode = #tpu.pipeline_mode<synchronous>, transform_indices = @transform_1, window_bounds = array<i64: 256, 128>}, {pipeline_mode = #tpu.pipeline_mode<synchronous>, transform_indices = @transform_2, window_bounds = array<i64: 1, 128>}, {pipeline_mode = #tpu.pipeline_mode<synchronous>, transform_indices = @transform_3, window_bounds = array<i64: 9, 128>}, {pipeline_mode = #tpu.pipeline_mode<synchronous>, transform_indices = @transform_4, window_bounds = array<i64: 1, 128>}, {transform_indices = @transform_5, window_bounds = array<i64: 1, 8, 128>}]} {
    %c0 = arith.constant 0 : index
    %c0_0 = arith.constant 0 : index
    %c0_1 = arith.constant 0 : index
    %0 = vector.load %arg1[%c0, %c0_0, %c0_1] : memref<1x8x256xf32, #tpu.memory_space<vmem>>, vector<1x8x256xf32>
    %1 = vector.shape_cast %0 : vector<1x8x256xf32> to vector<8x256xf32>
    %c0_2 = arith.constant 0 : index
    %c0_3 = arith.constant 0 : index
    %2 = vector.load %arg2[%c0_2, %c0_3] : memref<256x128xf32, #tpu.memory_space<vmem>>, vector<256x128xf32>
    %cst = arith.constant dense<0.000000e+00> : vector<8x128xf32>
    %3 = tpu.matmul %1, %2, %cst {dimension_numbers = #tpu.dot_dimension_numbers<[1], [0], [0], [1], [0, 0, 1, 1], [], []>} : vector<8x256xf32>, vector<256x128xf32>, vector<8x128xf32> -> vector<8x128xf32>
    %c0_4 = arith.constant 0 : index
    %c0_5 = arith.constant 0 : index
    %4 = vector.load %arg3[%c0_4, %c0_5] : memref<1x128xf32, #tpu.memory_space<vmem>>, vector<1x128xf32>
    %5 = vector.broadcast %4 : vector<1x128xf32> to vector<8x128xf32>
    %6 = arith.addf %3, %5 : vector<8x128xf32>
    %cst_6 = arith.constant 0.000000e+00 : f32
    %cst_7 = arith.constant 6.000000e+00 : f32
    %7 = vector.broadcast %cst_6 : f32 to vector<8x128xf32>
    %8 = arith.maximumf %7, %6 : vector<8x128xf32>
    %9 = vector.broadcast %cst_7 : f32 to vector<8x128xf32>
    %10 = arith.minimumf %9, %8 : vector<8x128xf32>
    %11 = tpu.iota {dimensions = array<i32: 0>} : vector<8x128xi32>
    %c1_i32 = arith.constant 1 : i32
    %12 = vector.broadcast %c1_i32 : i32 to vector<8x128xi32>
    %13 = arith.cmpi sge, %11, %12 : vector<8x128xi32>
    %c1_i32_8 = arith.constant 1 : i32
    %14 = tpu.dynamic_rotate %10 by %c1_i32_8 dim 0 : vector<8x128xf32>, i32 -> vector<8x128xf32>
    %cst_9 = arith.constant 0.000000e+00 : f32
    %15 = vector.broadcast %cst_9 : f32 to vector<8x128xf32>
    %16 = arith.select %13, %14, %15 : vector<8x128xi1>, vector<8x128xf32>
    %c7_i32 = arith.constant 7 : i32
    %17 = vector.broadcast %c7_i32 : i32 to vector<8x128xi32>
    %18 = arith.cmpi slt, %11, %17 : vector<8x128xi32>
    %c7_i32_10 = arith.constant 7 : i32
    %19 = tpu.dynamic_rotate %10 by %c7_i32_10 dim 0 : vector<8x128xf32>, i32 -> vector<8x128xf32>
    %cst_11 = arith.constant 0.000000e+00 : f32
    %20 = vector.broadcast %cst_11 : f32 to vector<8x128xf32>
    %21 = arith.select %18, %19, %20 : vector<8x128xi1>, vector<8x128xf32>
    %c0_12 = arith.constant 0 : index
    %c0_13 = arith.constant 0 : index
    %22 = vector.load %arg4[%c0_12, %c0_13] : memref<9x128xf32, #tpu.memory_space<vmem>>, vector<9x128xf32>
    %cst_14 = arith.constant 0.000000e+00 : f32
    %23 = vector.broadcast %cst_14 : f32 to vector<8x128xf32>
    %24 = vector.extract_strided_slice %22 {offsets = [1, 0], sizes = [1, 128], strides = [1, 1]} : vector<9x128xf32> to vector<1x128xf32>
    %25 = vector.broadcast %24 : vector<1x128xf32> to vector<8x128xf32>
    %26 = arith.mulf %16, %25 : vector<8x128xf32>
    %27 = arith.addf %23, %26 : vector<8x128xf32>
    %c16_i32 = arith.constant 16 : i32
    %28 = tpu.dynamic_rotate %16 by %c16_i32 dim 1 : vector<8x128xf32>, i32 -> vector<8x128xf32>
    %29 = vector.extract_strided_slice %22 {offsets = [0, 0], sizes = [1, 128], strides = [1, 1]} : vector<9x128xf32> to vector<1x128xf32>
    %30 = vector.broadcast %29 : vector<1x128xf32> to vector<8x128xf32>
    %31 = arith.mulf %28, %30 : vector<8x128xf32>
    %32 = arith.addf %27, %31 : vector<8x128xf32>
    %c112_i32 = arith.constant 112 : i32
    %33 = tpu.dynamic_rotate %16 by %c112_i32 dim 1 : vector<8x128xf32>, i32 -> vector<8x128xf32>
    %34 = vector.extract_strided_slice %22 {offsets = [2, 0], sizes = [1, 128], strides = [1, 1]} : vector<9x128xf32> to vector<1x128xf32>
    %35 = vector.broadcast %34 : vector<1x128xf32> to vector<8x128xf32>
    %36 = arith.mulf %33, %35 : vector<8x128xf32>
    %37 = arith.addf %32, %36 : vector<8x128xf32>
    %38 = vector.extract_strided_slice %22 {offsets = [4, 0], sizes = [1, 128], strides = [1, 1]} : vector<9x128xf32> to vector<1x128xf32>
    %39 = vector.broadcast %38 : vector<1x128xf32> to vector<8x128xf32>
    %40 = arith.mulf %10, %39 : vector<8x128xf32>
    %41 = arith.addf %37, %40 : vector<8x128xf32>
    %c16_i32_15 = arith.constant 16 : i32
    %42 = tpu.dynamic_rotate %10 by %c16_i32_15 dim 1 : vector<8x128xf32>, i32 -> vector<8x128xf32>
    %43 = vector.extract_strided_slice %22 {offsets = [3, 0], sizes = [1, 128], strides = [1, 1]} : vector<9x128xf32> to vector<1x128xf32>
    %44 = vector.broadcast %43 : vector<1x128xf32> to vector<8x128xf32>
    %45 = arith.mulf %42, %44 : vector<8x128xf32>
    %46 = arith.addf %41, %45 : vector<8x128xf32>
    %c112_i32_16 = arith.constant 112 : i32
    %47 = tpu.dynamic_rotate %10 by %c112_i32_16 dim 1 : vector<8x128xf32>, i32 -> vector<8x128xf32>
    %48 = vector.extract_strided_slice %22 {offsets = [5, 0], sizes = [1, 128], strides = [1, 1]} : vector<9x128xf32> to vector<1x128xf32>
    %49 = vector.broadcast %48 : vector<1x128xf32> to vector<8x128xf32>
    %50 = arith.mulf %47, %49 : vector<8x128xf32>
    %51 = arith.addf %46, %50 : vector<8x128xf32>
    %52 = vector.extract_strided_slice %22 {offsets = [7, 0], sizes = [1, 128], strides = [1, 1]} : vector<9x128xf32> to vector<1x128xf32>
    %53 = vector.broadcast %52 : vector<1x128xf32> to vector<8x128xf32>
    %54 = arith.mulf %21, %53 : vector<8x128xf32>
    %55 = arith.addf %51, %54 : vector<8x128xf32>
    %c16_i32_17 = arith.constant 16 : i32
    %56 = tpu.dynamic_rotate %21 by %c16_i32_17 dim 1 : vector<8x128xf32>, i32 -> vector<8x128xf32>
    %57 = vector.extract_strided_slice %22 {offsets = [6, 0], sizes = [1, 128], strides = [1, 1]} : vector<9x128xf32> to vector<1x128xf32>
    %58 = vector.broadcast %57 : vector<1x128xf32> to vector<8x128xf32>
    %59 = arith.mulf %56, %58 : vector<8x128xf32>
    %60 = arith.addf %55, %59 : vector<8x128xf32>
    %c112_i32_18 = arith.constant 112 : i32
    %61 = tpu.dynamic_rotate %21 by %c112_i32_18 dim 1 : vector<8x128xf32>, i32 -> vector<8x128xf32>
    %62 = vector.extract_strided_slice %22 {offsets = [8, 0], sizes = [1, 128], strides = [1, 1]} : vector<9x128xf32> to vector<1x128xf32>
    %63 = vector.broadcast %62 : vector<1x128xf32> to vector<8x128xf32>
    %64 = arith.mulf %61, %63 : vector<8x128xf32>
    %65 = arith.addf %60, %64 : vector<8x128xf32>
    %c0_19 = arith.constant 0 : index
    %c0_20 = arith.constant 0 : index
    %66 = vector.load %arg5[%c0_19, %c0_20] : memref<1x128xf32, #tpu.memory_space<vmem>>, vector<1x128xf32>
    %67 = vector.broadcast %66 : vector<1x128xf32> to vector<8x128xf32>
    %68 = arith.addf %65, %67 : vector<8x128xf32>
    %cst_21 = arith.constant 0.000000e+00 : f32
    %cst_22 = arith.constant 6.000000e+00 : f32
    %69 = vector.broadcast %cst_21 : f32 to vector<8x128xf32>
    %70 = arith.maximumf %69, %68 : vector<8x128xf32>
    %71 = vector.broadcast %cst_22 : f32 to vector<8x128xf32>
    %72 = arith.minimumf %71, %70 : vector<8x128xf32>
    %c0_23 = arith.constant 0 : index
    %c0_24 = arith.constant 0 : index
    %c0_25 = arith.constant 0 : index
    %73 = vector.load %arg6[%c0_23, %c0_24, %c0_25] : memref<1x8x128xf32, #tpu.memory_space<vmem>>, vector<1x8x128xf32>
    %74 = vector.shape_cast %73 : vector<1x8x128xf32> to vector<8x128xf32>
    %75 = vector.shape_cast %72 : vector<8x128xf32> to vector<1x8x128xf32>
    tpu.vector_store %arg6[%c0_23, %c0_24, %c0_25], %75 {strides = array<i32>} : memref<1x8x128xf32, #tpu.memory_space<vmem>>, vector<1x8x128xf32>,
    return
  }
  func.func @transform_0(%arg0: i32) -> (i32, i32, i32) {
    %c0_i32 = arith.constant 0 : i32
    %c0_i32_0 = arith.constant 0 : i32
    %c0_i32_1 = arith.constant 0 : i32
    return %arg0, %c0_i32, %c0_i32_0 : i32, i32, i32
  }
  func.func @transform_1(%arg0: i32) -> (i32, i32) {
    %c0_i32 = arith.constant 0 : i32
    %c0_i32_0 = arith.constant 0 : i32
    %c0_i32_1 = arith.constant 0 : i32
    return %c0_i32, %c0_i32_0 : i32, i32
  }
  func.func @transform_2(%arg0: i32) -> (i32, i32) {
    %c0_i32 = arith.constant 0 : i32
    %c0_i32_0 = arith.constant 0 : i32
    %c0_i32_1 = arith.constant 0 : i32
    return %c0_i32, %c0_i32_0 : i32, i32
  }
  func.func @transform_3(%arg0: i32) -> (i32, i32) {
    %c0_i32 = arith.constant 0 : i32
    %c0_i32_0 = arith.constant 0 : i32
    %c0_i32_1 = arith.constant 0 : i32
    return %c0_i32, %c0_i32_0 : i32, i32
  }
  func.func @transform_4(%arg0: i32) -> (i32, i32) {
    %c0_i32 = arith.constant 0 : i32
    %c0_i32_0 = arith.constant 0 : i32
    %c0_i32_1 = arith.constant 0 : i32
    return %c0_i32, %c0_i32_0 : i32, i32
  }
  func.func @transform_5(%arg0: i32) -> (i32, i32, i32) {
    %c0_i32 = arith.constant 0 : i32
    %c0_i32_0 = arith.constant 0 : i32
    %c0_i32_1 = arith.constant 0 : i32
    return %arg0, %c0_i32, %c0_i32_0 : i32, i32, i32
  }
}

module attributes {stable_mosaic.version = 11 : i64} {
  func.func @_tail_kernel(%arg0: i32, %arg1: i32, %arg2: memref<1x64x16xf32, #tpu.memory_space<vmem>>, %arg3: memref<16x32xf32, #tpu.memory_space<vmem>>, %arg4: memref<1x32xf32, #tpu.memory_space<vmem>>, %arg5: memref<32x1024xf32, #tpu.memory_space<vmem>>, %arg6: memref<1x1024xf32, #tpu.memory_space<vmem>>, %arg7: memref<1024x128xf32, #tpu.memory_space<vmem>>, %arg8: memref<1x128xf32, #tpu.memory_space<vmem>>, %arg9: memref<128x128xf32, #tpu.memory_space<vmem>>, %arg10: memref<1x128xf32, #tpu.memory_space<vmem>>, %arg11: memref<1x1x128xf32, #tpu.memory_space<vmem>>, %arg12: memref<1x1024xf32, #tpu.memory_space<vmem>>) attributes {dimension_semantics = [#tpu.dimension_semantics<parallel>, #tpu.dimension_semantics<arbitrary>], iteration_bounds = array<i64: 2, 1>, scalar_prefetch = 0 : i64, scratch_operands = 1 : i64, tpu.core_type = #tpu.core_type<tc>, window_params = [{transform_indices = @transform_0, window_bounds = array<i64: 1, 64, 16>}, {pipeline_mode = #tpu.pipeline_mode<synchronous>, transform_indices = @transform_1, window_bounds = array<i64: 16, 32>}, {pipeline_mode = #tpu.pipeline_mode<synchronous>, transform_indices = @transform_2, window_bounds = array<i64: 1, 32>}, {pipeline_mode = #tpu.pipeline_mode<synchronous>, transform_indices = @transform_3, window_bounds = array<i64: 32, 1024>}, {pipeline_mode = #tpu.pipeline_mode<synchronous>, transform_indices = @transform_4, window_bounds = array<i64: 1, 1024>}, {pipeline_mode = #tpu.pipeline_mode<synchronous>, transform_indices = @transform_5, window_bounds = array<i64: 1024, 128>}, {pipeline_mode = #tpu.pipeline_mode<synchronous>, transform_indices = @transform_6, window_bounds = array<i64: 1, 128>}, {pipeline_mode = #tpu.pipeline_mode<synchronous>, transform_indices = @transform_7, window_bounds = array<i64: 128, 128>}, {pipeline_mode = #tpu.pipeline_mode<synchronous>, transform_indices = @transform_8, window_bounds = array<i64: 1, 128>}, {transform_indices = @transform_9, window_bounds = array<i64: 1, 1, 128>}]} {
    %c0_i32 = arith.constant 0 : i32
    %0 = arith.cmpi eq, %arg1, %c0_i32 : i32
    %1 = arith.extui %0 : i1 to i32
    %c0_i32_0 = arith.constant 0 : i32
    %2 = arith.cmpi ne, %1, %c0_i32_0 : i32
    scf.if %2 {
      %cst_24 = arith.constant 0.000000e+00 : f32
      %31 = vector.broadcast %cst_24 : f32 to vector<1x1024xf32>
      %c0_25 = arith.constant 0 : index
      %c0_26 = arith.constant 0 : index
      %32 = vector.load %arg12[%c0_25, %c0_26] : memref<1x1024xf32, #tpu.memory_space<vmem>>, vector<1x1024xf32>
      tpu.vector_store %arg12[%c0_25, %c0_26], %31 {strides = array<i32>} : memref<1x1024xf32, #tpu.memory_space<vmem>>, vector<1x1024xf32>,
    } else {
    }
    %c0 = arith.constant 0 : index
    %c0_1 = arith.constant 0 : index
    %c0_2 = arith.constant 0 : index
    %3 = vector.load %arg2[%c0, %c0_1, %c0_2] : memref<1x64x16xf32, #tpu.memory_space<vmem>>, vector<1x64x16xf32>
    %4 = vector.shape_cast %3 : vector<1x64x16xf32> to vector<64x16xf32>
    %c0_3 = arith.constant 0 : index
    %c0_4 = arith.constant 0 : index
    %5 = vector.load %arg3[%c0_3, %c0_4] : memref<16x32xf32, #tpu.memory_space<vmem>>, vector<16x32xf32>
    %cst = arith.constant dense<0.000000e+00> : vector<64x32xf32>
    %6 = tpu.matmul %4, %5, %cst {dimension_numbers = #tpu.dot_dimension_numbers<[1], [0], [0], [1], [0, 0, 1, 1], [], []>} : vector<64x16xf32>, vector<16x32xf32>, vector<64x32xf32> -> vector<64x32xf32>
    %c0_5 = arith.constant 0 : index
    %c0_6 = arith.constant 0 : index
    %7 = vector.load %arg4[%c0_5, %c0_6] : memref<1x32xf32, #tpu.memory_space<vmem>>, vector<1x32xf32>
    %8 = vector.broadcast %7 : vector<1x32xf32> to vector<64x32xf32>
    %9 = arith.addf %6, %8 : vector<64x32xf32>
    %cst_7 = arith.constant 0.000000e+00 : f32
    %cst_8 = arith.constant 6.000000e+00 : f32
    %10 = vector.broadcast %cst_7 : f32 to vector<64x32xf32>
    %11 = arith.maximumf %10, %9 : vector<64x32xf32>
    %12 = vector.broadcast %cst_8 : f32 to vector<64x32xf32>
    %13 = arith.minimumf %12, %11 : vector<64x32xf32>
    %c0_9 = arith.constant 0 : index
    %c0_10 = arith.constant 0 : index
    %14 = vector.load %arg5[%c0_9, %c0_10] : memref<32x1024xf32, #tpu.memory_space<vmem>>, vector<32x1024xf32>
    %cst_11 = arith.constant dense<0.000000e+00> : vector<64x1024xf32>
    %15 = tpu.matmul %13, %14, %cst_11 {dimension_numbers = #tpu.dot_dimension_numbers<[1], [0], [0], [1], [0, 0, 1, 1], [], []>} : vector<64x32xf32>, vector<32x1024xf32>, vector<64x1024xf32> -> vector<64x1024xf32>
    %c0_12 = arith.constant 0 : index
    %c0_13 = arith.constant 0 : index
    %16 = vector.load %arg6[%c0_12, %c0_13] : memref<1x1024xf32, #tpu.memory_space<vmem>>, vector<1x1024xf32>
    %17 = vector.broadcast %16 : vector<1x1024xf32> to vector<64x1024xf32>
    %18 = arith.addf %15, %17 : vector<64x1024xf32>
    %cst_14 = arith.constant 0.000000e+00 : f32
    %cst_15 = arith.constant 6.000000e+00 : f32
    %19 = vector.broadcast %cst_14 : f32 to vector<64x1024xf32>
    %20 = arith.maximumf %19, %18 : vector<64x1024xf32>
    %21 = vector.broadcast %cst_15 : f32 to vector<64x1024xf32>
    %22 = arith.minimumf %21, %20 : vector<64x1024xf32>
    %cst_16 = arith.constant 1.000000e+00 : f32
    %23 = vector.broadcast %cst_16 : f32 to vector<1x64xf32>
    %c0_17 = arith.constant 0 : index
    %c0_18 = arith.constant 0 : index
    %24 = vector.load %arg12[%c0_17, %c0_18] : memref<1x1024xf32, #tpu.memory_space<vmem>>, vector<1x1024xf32>
    %cst_19 = arith.constant dense<0.000000e+00> : vector<1x1024xf32>
    %25 = tpu.matmul %23, %22, %cst_19 {dimension_numbers = #tpu.dot_dimension_numbers<[1], [0], [0], [1], [0, 0, 1, 1], [], []>} : vector<1x64xf32>, vector<64x1024xf32>, vector<1x1024xf32> -> vector<1x1024xf32>
    %26 = arith.addf %24, %25 : vector<1x1024xf32>
    %c0_20 = arith.constant 0 : index
    %c0_21 = arith.constant 0 : index
    %27 = vector.load %arg12[%c0_20, %c0_21] : memref<1x1024xf32, #tpu.memory_space<vmem>>, vector<1x1024xf32>
    tpu.vector_store %arg12[%c0_20, %c0_21], %26 {strides = array<i32>} : memref<1x1024xf32, #tpu.memory_space<vmem>>, vector<1x1024xf32>,
    %c0_i32_22 = arith.constant 0 : i32
    %28 = arith.cmpi eq, %arg1, %c0_i32_22 : i32
    %29 = arith.extui %28 : i1 to i32
    %c0_i32_23 = arith.constant 0 : i32
    %30 = arith.cmpi ne, %29, %c0_i32_23 : i32
    scf.if %30 {
      %c0_24 = arith.constant 0 : index
      %c0_25 = arith.constant 0 : index
      %31 = vector.load %arg12[%c0_24, %c0_25] : memref<1x1024xf32, #tpu.memory_space<vmem>>, vector<1x1024xf32>
      %cst_26 = arith.constant 1.562500e-02 : f32
      %32 = vector.broadcast %cst_26 : f32 to vector<1x1024xf32>
      %33 = arith.mulf %31, %32 : vector<1x1024xf32>
      %c0_27 = arith.constant 0 : index
      %c0_28 = arith.constant 0 : index
      %34 = vector.load %arg7[%c0_27, %c0_28] : memref<1024x128xf32, #tpu.memory_space<vmem>>, vector<1024x128xf32>
      %cst_29 = arith.constant dense<0.000000e+00> : vector<1x128xf32>
      %35 = tpu.matmul %33, %34, %cst_29 {dimension_numbers = #tpu.dot_dimension_numbers<[1], [0], [0], [1], [0, 0, 1, 1], [], []>} : vector<1x1024xf32>, vector<1024x128xf32>, vector<1x128xf32> -> vector<1x128xf32>
      %c0_30 = arith.constant 0 : index
      %c0_31 = arith.constant 0 : index
      %36 = vector.load %arg8[%c0_30, %c0_31] : memref<1x128xf32, #tpu.memory_space<vmem>>, vector<1x128xf32>
      %37 = arith.addf %35, %36 : vector<1x128xf32>
      %cst_32 = arith.constant 0.000000e+00 : f32
      %38 = vector.broadcast %cst_32 : f32 to vector<1x128xf32>
      %39 = arith.maximumf %37, %38 : vector<1x128xf32>
      %c0_33 = arith.constant 0 : index
      %c0_34 = arith.constant 0 : index
      %40 = vector.load %arg9[%c0_33, %c0_34] : memref<128x128xf32, #tpu.memory_space<vmem>>, vector<128x128xf32>
      %cst_35 = arith.constant dense<0.000000e+00> : vector<1x128xf32>
      %41 = tpu.matmul %39, %40, %cst_35 {dimension_numbers = #tpu.dot_dimension_numbers<[1], [0], [0], [1], [0, 0, 1, 1], [], []>} : vector<1x128xf32>, vector<128x128xf32>, vector<1x128xf32> -> vector<1x128xf32>
      %c0_36 = arith.constant 0 : index
      %c0_37 = arith.constant 0 : index
      %42 = vector.load %arg10[%c0_36, %c0_37] : memref<1x128xf32, #tpu.memory_space<vmem>>, vector<1x128xf32>
      %43 = arith.addf %41, %42 : vector<1x128xf32>
      %c0_38 = arith.constant 0 : index
      %c0_39 = arith.constant 0 : index
      %c0_40 = arith.constant 0 : index
      %44 = vector.load %arg11[%c0_38, %c0_39, %c0_40] : memref<1x1x128xf32, #tpu.memory_space<vmem>>, vector<1x1x128xf32>
      %45 = vector.shape_cast %44 : vector<1x1x128xf32> to vector<1x128xf32>
      %46 = vector.shape_cast %43 : vector<1x128xf32> to vector<1x1x128xf32>
      tpu.vector_store %arg11[%c0_38, %c0_39, %c0_40], %46 {strides = array<i32>} : memref<1x1x128xf32, #tpu.memory_space<vmem>>, vector<1x1x128xf32>,
    } else {
    }
    return
  }
  func.func @transform_0(%arg0: i32, %arg1: i32) -> (i32, i32, i32) {
    %c0_i32 = arith.constant 0 : i32
    %c0_i32_0 = arith.constant 0 : i32
    return %arg0, %arg1, %c0_i32 : i32, i32, i32
  }
  func.func @transform_1(%arg0: i32, %arg1: i32) -> (i32, i32) {
    %c0_i32 = arith.constant 0 : i32
    %c0_i32_0 = arith.constant 0 : i32
    %c0_i32_1 = arith.constant 0 : i32
    return %c0_i32, %c0_i32_0 : i32, i32
  }
  func.func @transform_2(%arg0: i32, %arg1: i32) -> (i32, i32) {
    %c0_i32 = arith.constant 0 : i32
    %c0_i32_0 = arith.constant 0 : i32
    %c0_i32_1 = arith.constant 0 : i32
    return %c0_i32, %c0_i32_0 : i32, i32
  }
  func.func @transform_3(%arg0: i32, %arg1: i32) -> (i32, i32) {
    %c0_i32 = arith.constant 0 : i32
    %c0_i32_0 = arith.constant 0 : i32
    %c0_i32_1 = arith.constant 0 : i32
    return %c0_i32, %c0_i32_0 : i32, i32
  }
  func.func @transform_4(%arg0: i32, %arg1: i32) -> (i32, i32) {
    %c0_i32 = arith.constant 0 : i32
    %c0_i32_0 = arith.constant 0 : i32
    %c0_i32_1 = arith.constant 0 : i32
    return %c0_i32, %c0_i32_0 : i32, i32
  }
  func.func @transform_5(%arg0: i32, %arg1: i32) -> (i32, i32) {
    %c0_i32 = arith.constant 0 : i32
    %c0_i32_0 = arith.constant 0 : i32
    %c0_i32_1 = arith.constant 0 : i32
    return %c0_i32, %c0_i32_0 : i32, i32
  }
  func.func @transform_6(%arg0: i32, %arg1: i32) -> (i32, i32) {
    %c0_i32 = arith.constant 0 : i32
    %c0_i32_0 = arith.constant 0 : i32
    %c0_i32_1 = arith.constant 0 : i32
    return %c0_i32, %c0_i32_0 : i32, i32
  }
  func.func @transform_7(%arg0: i32, %arg1: i32) -> (i32, i32) {
    %c0_i32 = arith.constant 0 : i32
    %c0_i32_0 = arith.constant 0 : i32
    %c0_i32_1 = arith.constant 0 : i32
    return %c0_i32, %c0_i32_0 : i32, i32
  }
  func.func @transform_8(%arg0: i32, %arg1: i32) -> (i32, i32) {
    %c0_i32 = arith.constant 0 : i32
    %c0_i32_0 = arith.constant 0 : i32
    %c0_i32_1 = arith.constant 0 : i32
    return %c0_i32, %c0_i32_0 : i32, i32
  }
  func.func @transform_9(%arg0: i32, %arg1: i32) -> (i32, i32, i32) {
    %c0_i32 = arith.constant 0 : i32
    %c0_i32_0 = arith.constant 0 : i32
    %c0_i32_1 = arith.constant 0 : i32
    return %arg0, %c0_i32, %c0_i32_0 : i32, i32, i32
  }
}

</mosaic_0001>

<bundles_post_ra>
// kernel: mobilenet_ssd_v2_forward.2
= control target key start
LH: loop header
LB: loop body
LE: loop exit
PB: predicated region body
PF: predicated region fallthrough
CT: control target
= control target key end

     0   :  { %s575_s18 = smov 0   ;;  %s708_s0 = inlined_call_operand.vmem [shape: f32[2,8,256], index: 0, kind: input, shape index: {}]   ;;  %s709_s1 = inlined_call_operand.vmem [shape: f32[256,128], index: 1, kind: input, shape index: {}]   ;;  %s710_s2 = inlined_call_operand.vmem [shape: f32[1,128], index: 2, kind: input, shape index: {}]   ;;  %s711_s3 = inlined_call_operand.vmem [shape: f32[9,128], index: 3, kind: input, shape index: {}]   ;;  %s712_s4 = inlined_call_operand.vmem [shape: f32[1,128], index: 4, kind: input, shape index: {}]   ;;  %s713_s5 = inlined_call_operand.vmem [shape: f32[2,8,128], index: 5, kind: output, shape index: {}]  }
   0x1 LB: > { %s476_s19 = sadd.s32 4294967295, %s541_s18   ;;  %p480_p0 = scmp.ge.s32.totalorder %s541_s18, 1  ;;  %s541_s18 = sphi %s575_s18, %s15_s18  }
   0x2   : > { %p187_p1 = scmp.lt.s32.totalorder %s541_s18, 3 }
   0x4   : > { %p188_p2 = pnand %p480_p0, %p187_p1 }
   0x5   : > { %p214_p3 = scmp.lt.s32.totalorder (!%p188_p2), %s476_s19, 1  ;;  %s543_s23 = smov (!%p188_p2), 16  }
   0x6   : > { %191 = sbr.rel (%p188_p2) target bundleno = 392 (0x188), region = 40 }
   0xb   : > { %v256_v0 = vld [vmem:[%s709_s1 + $0xf8] sm:$0xff]  ;;  %v255_v2 = vld [vmem:[%s709_s1 + $0xf0] sm:$0xff]  ;;  %v254_v4 = vld [vmem:[%s709_s1 + $0xe8] sm:$0xff]  ;;  %s715_s19 = smov (!%p214_p3, %s476_s19), 1  ;;  %v336_v38 = vlaneseq }
   0xc   : > { %v240_v1 = vld [vmem:[%s709_s1 + $0x78] sm:$0xff]  ;;  %490 = vmatprep.subr.mxu0 %v256_v0  ;;  %v239_v3 = vld [vmem:[%s709_s1 + $0x70] sm:$0xff]  ;;  %v238_v5 = vld [vmem:[%s709_s1 + $0x68] sm:$0xff]  ;;  %s489_s9 = sshll.u32 %s715_s19, 4  ;;  %s483_s30 = sshll.u32 %s715_s19, 3 }
   0xd   : > { %491 = vmatpush3.msra.mxu0 %v240_v1  ;;  %v253_v6 = vld [vmem:[%s709_s1 + $0xe0] sm:$0xff]  ;;  %v252_v8 = vld [vmem:[%s709_s1 + $0xd8] sm:$0xff]  ;;  %s619_s20 = scalar_lea.vmem %s708_s0, %s489_s9  ;;  %v251_v10 = vld [vmem:[%s709_s1 + $0xd0] sm:$0xff]  ;;  %v337_v41 = vshrl.u32 %v336_v38, 7  ;;  %s222_s8 = scalar_lea.vmem %s713_s5, %s483_s30 }
   0xe   : > { %492 = vmatprep.subr.mxu0 %v255_v2  ;;  %v237_v7 = vld [vmem:[%s709_s1 + $0x60] sm:$0xff]  ;;  %v236_v9 = vld [vmem:[%s709_s1 + $0x58] sm:$0xff]  ;;  %v235_v11 = vld [vmem:[%s709_s1 + $0x50] sm:$0xff] }
   0xf   : > { %493 = vmatpush3.msra.mxu0 %v239_v3  ;;  %v250_v12 = vld [vmem:[%s709_s1 + $0xc8] sm:$0xff]  ;;  %v249_v15 = vld [vmem:[%s709_s1 + $0xc0] sm:$0xff]  ;;  %v248_v17 = vld [vmem:[%s709_s1 + $0xb8] sm:$0xff]  ;;  %vm338_vm0 = vcmp.ge.s32.totalorder %v337_v41, 1  ;;  %vm341_vm1 = vcmp.lt.s32.totalorder %v337_v41, 7  ;;  %v356_v47 = vsub.s32 0, %v337_v41 }
  0x10   : > { %494 = vmatprep.subr.mxu0 %v254_v4  ;;  %v224_v13 = vld [vmem:[%s619_s20 + $0x8] sm:$0xff]  ;;  %v233_v16 = vld [vmem:[%s709_s1 + $0x40] sm:$0xff]  ;;  %v232_v18 = vld [vmem:[%s709_s1 + $0x38] sm:$0xff]  ;;  %v348_v48 = vsub.s32 1, %v337_v41  ;;  %v364_v51 = vsub.s32 2, %v337_v41  ;;  %v370_v53 = vsub.s32 4, %v337_v41 }
  0x11   : > { %495 = vmatpush3.msra.mxu0 %v238_v5  ;;  %v234_v14 = vld [vmem:[%s709_s1 + $0x48] sm:$0xff]  ;;  %328 = vmatprep.mubr.f32.mxu0 %v224_v13  ;;  %v247_v19 = vld [vmem:[%s709_s1 + $0xb0] sm:$0xff]  ;;  %v245_v23 = vld [vmem:[%s709_s1 + $0xa0] sm:$0xff]  ;;  %v378_v55 = vsub.s32 3, %v337_v41  ;;  %v386_v60 = vsub.s32 5, %v337_v41  ;;  %v392_v63 = vsub.s32 7, %v337_v41 }
  0x12   : > { %496 = vmatprep.subr.mxu0 %v253_v6  ;;  %v231_v20 = vld [vmem:[%s709_s1 + $0x30] sm:$0xff]  ;;  %v246_v21 = vld [vmem:[%s709_s1 + $0xa8] sm:$0xff]  ;;  %v229_v24 = vld [vmem:[%s709_s1 + $0x20] sm:$0xff]  ;;  %v400_v6 = vsub.s32 6, %v337_v41 }
  0x13   : > { %497 = vmatpush3.msra.mxu0 %v237_v7  ;;  %v230_v22 = vld [vmem:[%s709_s1 + $0x28] sm:$0xff]  ;;  %v244_v25 = vld [vmem:[%s709_s1 + $0x98] sm:$0xff]  ;;  %v243_v27 = vld [vmem:[%s709_s1 + $0x90] sm:$0xff] }
  0x14   : > { %498 = vmatprep.subr.mxu0 %v252_v8  ;;  %v228_v26 = vld [vmem:[%s709_s1 + $0x18] sm:$0xff]  ;;  %v227_v28 = vld [vmem:[%s709_s1 + $0x10] sm:$0xff]  ;;  %v242_v29 = vld [vmem:[%s709_s1 + $0x88] sm:$0xff] }
  0x15   : > { %499 = vmatpush3.msra.mxu0 %v236_v9  ;;  %v226_v30 = vld [vmem:[%s709_s1 + $0x8] sm:$0xff]  ;;  %v241_v31 = vld [vmem:[%s709_s1 + $0x80] sm:$0xff] }
  0x16   : > { %500 = vmatprep.subr.mxu0 %v251_v10  ;;  %v225_v32 = vld [vmem:[%s709_s1] sm:$0xff] }
  0x17   : > { %501 = vmatpush3.msra.mxu0 %v235_v11  ;;  %v223_v33 = vld [vmem:[%s619_s20] sm:$0xff]  ;;  %s544_s20 = smov 112  }
  0x18   : > { %502 = vmatprep.subr.mxu0 %v250_v12  ;;  %v484_v35 = vld [vmem:[%s710_s2] ss:$0 sm:$0xff] }
  0x19   : > { %503 = vmatpush3.msra.mxu0 %v234_v14  ;;  %v344_v49 = vld [vmem:[%s711_s3] sm:$0xff] }
  0x1a   : > { %504 = vmatprep.subr.mxu0 %v249_v15  ;;  %v357_v50 = vrot.slane %v344_v49, %v356_v47  ;;  %v349_v52 = vrot.slane %v344_v49, %v348_v48  ;;  %v365_v57 = vrot.slane %v344_v49, %v364_v51  ;;  %v371_v61 = vrot.slane %v344_v49, %v370_v53 }
  0x1b   : > { %505 = vmatpush3.msra.mxu0 %v233_v16  ;;  %v379_v0 = vrot.slane %v344_v49, %v378_v55  ;;  %v387_v3 = vrot.slane %v344_v49, %v386_v60  ;;  %v393_v8 = vrot.slane %v344_v49, %v392_v63  ;;  %v401_v13 = vrot.slane %v344_v49, %v400_v6 }
  0x1c   : > { %506 = vmatprep.subr.mxu0 %v248_v17  ;;  %v485_v17 = vld [vmem:[%s711_s3 + $0x8] ss:$0 sm:$0xff] }
  0x1d   : > { %507 = vmatpush3.msra.mxu0 %v232_v18 }
  0x1e   : > { %508 = vmatprep.subr.mxu0 %v247_v19 }
  0x1f   : > { %509 = vmatpush3.msra.mxu0 %v231_v20 }
  0x20   : > { %510 = vmatprep.subr.mxu0 %v246_v21 }
  0x21   : > { %511 = vmatpush3.msra.mxu0 %v230_v22 }
  0x22   : > { %512 = vmatprep.subr.mxu0 %v245_v23  ;;  %v486_v23 = vld [vmem:[%s712_s4] ss:$0 sm:$0xff] }
  0x23   : > { %513 = vmatpush3.msra.mxu0 %v229_v24 }
  0x24   : > { %514 = vmatprep.subr.mxu0 %v244_v25 }
  0x25   : > { %515 = vmatpush3.msra.mxu0 %v228_v26 }
  0x26   : > { %516 = vmatprep.subr.mxu0 %v243_v27 }
  0x27   : > { %517 = vmatpush3.msra.mxu0 %v227_v28 }
  0x28   : > { %518 = vmatprep.subr.mxu0 %v242_v29 }
  0x29   : > { %519 = vmatpush3.msra.mxu0 %v226_v30 }
  0x2a   : > { %520 = vmatprep.subr.mxu0 %v241_v31 }
  0x2b   : > { %521 = vmatpush3.msra.mxu0 %v225_v32 }
  0x2c   : > { %329 = vmatmul.mubr.f32.vlgmr.msra.gmra.mxu0 %v223_v33 }
  0xec   : > { %v522_v34 = vpop.f32.mrf.mxu0 }
  0xee   : > { %v523_v36 = vpop.f32.mrf.mxu0 }
  0xef   : > { %v524_v37 = vadd.f32 %v523_v36, %v522_v34 }
  0xf1   : > { %v331_v39 = vadd.f32 %v524_v37, %v484_v35 }
  0xf3   : > { %v334_v40 = vmax.f32 %v331_v39, 0.0 }
  0xf5   : > { %v335_v42 = vmin.f32 %v334_v40, 6.0 }
  0xf7   : > { %374 = vrot.lane.b32.xlu1 %v335_v42, %s543_s23  ;;  %v339_v43 = vrot.slane %v335_v42, 7  ;;  %v342_v45 = vrot.slane %v335_v42, 1  ;;  %v372_v4 = vmul.f32 %v371_v61, %v335_v42 }
  0xf9   : > { %v340_v44 = vsel %vm338_vm0, %v339_v43, 0.0  ;;  %v343_v46 = vsel %vm341_vm1, %v342_v45, 0.0 }
  0xfa   : > { %352 = vrot.lane.b32.xlu0 %v340_v44, %s543_s23  ;;  %v350_v59 = vmul.f32 %v349_v52, %v340_v44  ;;  %v394_v15 = vmul.f32 %v393_v8, %v343_v46 }
  0xfb   : > { %382 = vrot.lane.b32.xlu1 %v335_v42, %s544_s20 }
  0xfe   : > { %360 = vrot.lane.b32.xlu0 %v340_v44, %s544_s20 }
  0xff   : > { %404 = vrot.lane.b32.xlu1 %v343_v46, %s544_s20 }
 0x102   : > { %396 = vrot.lane.b32.xlu0 %v343_v46, %s543_s23 }
 0x169   : > { %v375_v58 = vpop.permute.xlu1 %374 }
 0x16a   : > { %v380_v9 = vmul.f32 %v379_v0, %v375_v58 }
 0x16c   : > { %v353_v54 = vpop.permute.xlu0 %352 }
 0x16d   : > { %v358_v56 = vmul.f32 %v357_v50, %v353_v54  ;;  %v383_v7 = vpop.permute.xlu1 %382 }
 0x16e   : > { %v388_v11 = vmul.f32 %v387_v3, %v383_v7 }
 0x16f   : > { %v359_v1 = vadd.f32 %v358_v56, %v350_v59 }
 0x170   : > { %v361_v62 = vpop.permute.xlu0 %360 }
 0x171   : > { %v366_v2 = vmul.f32 %v365_v57, %v361_v62  ;;  %v405_v18 = vpop.permute.xlu1 %404 }
 0x172   : > { %v410_v21 = vmul.f32 %v485_v17, %v405_v18 }
 0x173   : > { %v367_v5 = vadd.f32 %v366_v2, %v359_v1 }
 0x174   : > { %v397_v14 = vpop.permute.xlu0 %396 }
 0x175   : > { %v373_v10 = vadd.f32 %v372_v4, %v367_v5  ;;  %v402_v20 = vmul.f32 %v401_v13, %v397_v14 }
 0x177   : > { %v381_v12 = vadd.f32 %v380_v9, %v373_v10 }
 0x179   : > { %v389_v16 = vadd.f32 %v388_v11, %v381_v12 }
 0x17b   : > { %v395_v19 = vadd.f32 %v394_v15, %v389_v16 }
 0x17d   : > { %v403_v22 = vadd.f32 %v402_v20, %v395_v19 }
 0x17f   : > { %v411_v24 = vadd.f32 %v410_v21, %v403_v22 }
 0x181   : > { %v419_v25 = vadd.f32 %v486_v23, %v411_v24 }
 0x183   : > { %v420_v26 = vmax.f32 %v419_v25, 0.0 }
 0x185   : > { %v421_v27 = vmin.f32 %v420_v26, 6.0 }
 0x187   : > { %422 = vst [vmem:[%s222_s8] sm:$0xff] %v421_v27 }
 0x188 PF: > { %s15_s18 = sadd.s32 1, %s541_s18  }
 0x189   : > { %p12_p4 = scmp.ge.s32.totalorder %s15_s18, 4  }
 0x18b   :  { %14 = sbr.rel (!%p12_p4) target bundleno = 1 (0x1), region = 70 }

// kernel: mobilenet_ssd_v2_forward.3
= control target key start
LH: loop header
LB: loop body
LE: loop exit
PB: predicated region body
PF: predicated region fallthrough
CT: control target
= control target key end

     0   :  { %s2545_s30 = smov 0   ;;  %s2547_s10 = smov 0   ;;  %s3490_s0 = inlined_call_operand.vmem [shape: f32[2,64,16], index: 0, kind: input, shape index: {}]   ;;  %s3491_s1 = inlined_call_operand.vmem [shape: f32[16,32], index: 1, kind: input, shape index: {}]   ;;  %s3492_s2 = inlined_call_operand.vmem [shape: f32[1,32], index: 2, kind: input, shape index: {}]   ;;  %s3493_s3 = inlined_call_operand.vmem [shape: f32[32,1024], index: 3, kind: input, shape index: {}]   ;;  %s3494_s4 = inlined_call_operand.vmem [shape: f32[1,1024], index: 4, kind: input, shape index: {}]   ;;  %s3495_s5 = inlined_call_operand.vmem [shape: f32[1024,128], index: 5, kind: input, shape index: {}]   ;;  %s3496_s6 = inlined_call_operand.vmem [shape: f32[1,128], index: 6, kind: input, shape index: {}]   ;;  %s3497_s7 = inlined_call_operand.vmem [shape: f32[128,128], index: 7, kind: input, shape index: {}]   ;;  %s3498_s8 = inlined_call_operand.vmem [shape: f32[1,128], index: 8, kind: input, shape index: {}]   ;;  %s3499_s9 = inlined_call_operand.vmem [shape: f32[2,1,128], index: 9, kind: output, shape index: {}]  }
   0x1   :  { %s2549_s11 = smov 0  }
   0x2 LB: > { %s31_s12 = sadd.s32 1, %s2485_s10  ;;  %p2162_p0 = scmp.ge.s32.totalorder %s2489_s11, 1  ;;  %s2489_s11 = sphi %s2549_s11, %s19_s11   ;;  %s2485_s10 = sphi %s2547_s10, %s3501_s10   ;;  %s2481_s30 = sphi %s2545_s30, %s3500_s30  }
   0x3   : > { %p33_p1 = scmp.ge.s32.totalorder %s31_s12, 2  ;;  %p306_p2 = scmp.lt.s32.totalorder %s2489_s11, 3 }
   0x5   : > { %s3503_s12 = smov (%p33_p1, %s31_s12), 0  ;;  %p307_p3 = pnand %p2162_p0, %p306_p2 }
   0x6   : > { %p345_p4 = scmp.lt.s32.totalorder (!%p307_p3), %s2481_s30, 1 }
   0x7   : > { %310 = sbr.rel (%p307_p3) target bundleno = 1147 (0x47b), region = 56 }
   0xc   : > { %v371_v0 = vld [vmem:[%s3491_s1 + $0x8] sm:$0xff]  ;;  %v370_v1 = vld [vmem:[%s3491_s1] sm:$0xff]  ;;  %s3505_s30 = smov (!%p345_p4, %s2481_s30), 1  ;;  %vm379_vm0 = vcmask 130048   ;;  %v2491_v18 = vmov 0.0   ;;  %v552_v19 = vld [vmem:[%s3493_s3 + $0xd8] sm:$0xff] }
   0xd   : > { %v550_v2 = vld [vmem:[%s3493_s3 + $0xc8] sm:$0xff]  ;;  %2380 = vmatprep.subr.mxu0 %v371_v0  ;;  %v549_v3 = vld [vmem:[%s3493_s3 + $0xc0] sm:$0xff]  ;;  %s2212_s25 = sshll.u32 %s3505_s30, 6  ;;  %700 = vmatprep.mubr.f32.mxu1 %v2491_v18  ;;  %vm599_vm1 = vcmask 261120   ;;  %v551_v33 = vld [vmem:[%s3493_s3 + $0xd0] sm:$0xff]  ;;  %vm1205_vm2 = vcmask 523264   ;;  %s356_s26 = scalar_lea.vmem %s3499_s9, %s3505_s30 }
   0xe   : > { %2431 = vmatprep.subr.mxu1 %v550_v2  ;;  %2381 = vmatpush3.msra.mxu0 %v371_v0  ;;  %v542_v4 = vld [vmem:[%s3493_s3 + $0x88] sm:$0xff]  ;;  %v541_v5 = vld [vmem:[%s3493_s3 + $0x80] sm:$0xff]  ;;  %s352_s28 = scalar_lea.vmem %s3490_s0, %s2212_s25  ;;  %v544_v34 = vld [vmem:[%s3493_s3 + $0x98] sm:$0xff]  ;;  %vm2494_vm3 = vmmov 0  }
   0xf   : > { %2435 = vmatpush1.msra.mxu1 %v549_v3  ;;  %2382 = vmatprep.subr.mxu0 %v370_v1  ;;  %v362_v6 = vld [vmem:[%s352_s28] sm:$0xff]  ;;  %v363_v7 = vld [vmem:[%s352_s28 + $0x8] sm:$0xff]  ;;  %v364_v8 = vld [vmem:[%s352_s28 + $0x10] sm:$0xff] }
  0x10   : > { %2432 = vmatprep.subr.mxu1 %v542_v4  ;;  %2383 = vmatpush3.msra.mxu0 %v370_v1  ;;  %v365_v9 = vld [vmem:[%s352_s28 + $0x18] sm:$0xff]  ;;  %v366_v10 = vld [vmem:[%s352_s28 + $0x20] sm:$0xff]  ;;  %v367_v11 = vld [vmem:[%s352_s28 + $0x28] sm:$0xff] }
  0x11   : > { %2436 = vmatpush1.msra.mxu1 %v541_v5  ;;  %648 = vmatprep.subr.mxu0 %v550_v2  ;;  %v368_v12 = vld [vmem:[%s352_s28 + $0x30] sm:$0xff]  ;;  %v369_v13 = vld [vmem:[%s352_s28 + $0x38] sm:$0xff]  ;;  %v534_v14 = vld [vmem:[%s3493_s3 + $0x48] sm:$0xff] }
  0x12   : > { %2384 = vmatprep.mubr.msk.f32.mxu0 %vm379_vm0, %v362_v6  ;;  %v533_v15 = vld [vmem:[%s3493_s3 + $0x40] sm:$0xff]  ;;  %2433 = vmatprep.subr.mxu1 %v534_v14  ;;  %v526_v16 = vld [vmem:[%s3493_s3 + $0x8] sm:$0xff]  ;;  %v543_v37 = vld [vmem:[%s3493_s3 + $0x90] sm:$0xff] }
  0x13   : > { %2385 = vmatmul.mubr.msk.f32.vlgmr.msra.gmra.mxu0 %vm379_vm0, %v363_v7  ;;  %2437 = vmatpush1.msra.mxu1 %v533_v15  ;;  %v525_v17 = vld [vmem:[%s3493_s3] sm:$0xff]  ;;  %v554_v20 = vld [vmem:[%s3493_s3 + $0xe8] sm:$0xff]  ;;  %v536_v39 = vld [vmem:[%s3493_s3 + $0x58] sm:$0xff] }
  0x14   : > { %2387 = vmatprep.mubr.msk.f32.mxu0 %vm379_vm0, %v364_v8  ;;  %649 = vmatpush1.msra.mxu0 %v549_v3  ;;  %v2618_v22 = vld [vmem:[%s3492_s2] ss:$0 sm:$0xff]  ;;  %v535_v43 = vld [vmem:[%s3493_s3 + $0x50] sm:$0xff]  ;;  %v528_v45 = vld [vmem:[%s3493_s3 + $0x18] sm:$0xff] }
  0x15   : > { %650 = vmatprep.subr.mxu0 %v542_v4  ;;  %2434 = vmatprep.subr.mxu1 %v526_v16  ;;  %v527_v47 = vld [vmem:[%s3493_s3 + $0x10] sm:$0xff]  ;;  %v556_v51 = vld [vmem:[%s3493_s3 + $0xf8] sm:$0xff]  ;;  %v553_v55 = vld [vmem:[%s3493_s3 + $0xe0] sm:$0xff] }
  0x16   : > { %651 = vmatpush1.msra.mxu0 %v541_v5  ;;  %2438 = vmatpush1.msra.mxu1 %v525_v17  ;;  %v555_v52 = vld [vmem:[%s3493_s3 + $0xf0] sm:$0xff]  ;;  %v548_v54 = vld [vmem:[%s3493_s3 + $0xb8] sm:$0xff]  ;;  %v546_v59 = vld [vmem:[%s3493_s3 + $0xa8] sm:$0xff] }
  0x17   : > { %2388 = vmatmul.mubr.msk.f32.gmra.mxu0 %vm379_vm0, %v365_v9  ;;  %652 = vmatprep.subr.mxu0 %v534_v14  ;;  %v547_v60 = vld [vmem:[%s3493_s3 + $0xb0] sm:$0xff]  ;;  %v545_v61 = vld [vmem:[%s3493_s3 + $0xa0] sm:$0xff]  ;;  %v540_v62 = vld [vmem:[%s3493_s3 + $0x78] sm:$0xff] }
  0x18   : > { %2390 = vmatprep.mubr.msk.f32.mxu0 %vm379_vm0, %v366_v10  ;;  %653 = vmatpush1.msra.mxu0 %v533_v15  ;;  %v538_v2 = vld [vmem:[%s3493_s3 + $0x68] sm:$0xff]  ;;  %v539_v3 = vld [vmem:[%s3493_s3 + $0x70] sm:$0xff]  ;;  %v537_v4 = vld [vmem:[%s3493_s3 + $0x60] sm:$0xff] }
  0x19   : > { %654 = vmatprep.subr.mxu0 %v526_v16  ;;  %874 = vmatprep.subr.mxu1 %v554_v20  ;;  %v532_v5 = vld [vmem:[%s3493_s3 + $0x38] sm:$0xff]  ;;  %v530_v8 = vld [vmem:[%s3493_s3 + $0x28] sm:$0xff]  ;;  %v529_v9 = vld [vmem:[%s3493_s3 + $0x20] sm:$0xff] }
  0x1a   : > { %655 = vmatpush1.msra.mxu0 %v525_v17  ;;  %v531_v10 = vld [vmem:[%s3493_s3 + $0x30] sm:$0xff] }
  0x1b   : > { %2391 = vmatmul.mubr.msk.f32.gmra.mxu0 %vm379_vm0, %v367_v11  ;;  %761 = vmatprep.subr.mxu0 %v552_v19 }
  0x1c   : > { %2393 = vmatprep.mubr.msk.f32.mxu0 %vm379_vm0, %v368_v12 }
  0x1f   : > { %2394 = vmatmul.mubr.msk.f32.gmra.mxu0 %vm379_vm0, %v369_v13 }
  0x20   : > { %688 = vmatprep.mubr.f32.mxu0 %v2491_v18 }
  0xd3   : > { %v2386_v21 = vpop.f32.mrf.mxu0 }
  0xd4   : > { %v476_v24 = vadd.f32 %v2386_v21, %v2618_v22 }
  0xd5   : > { %v470_v23 = vpop.f32.mrf.mxu0 }
  0xd6   : > { %v471_v25 = vadd.f32 %v2618_v22, %v470_v23  ;;  %v510_v30 = vmax.f32 %v476_v24, 0.0 }
  0xd7   : > { %v2389_v26 = vpop.f32.mrf.mxu0 }
  0xd8   : > { %v509_v27 = vmax.f32 %v471_v25, 0.0  ;;  %v486_v28 = vadd.f32 %v2389_v26, %v2618_v22  ;;  %v2641_v41 = vmin.f32 %v510_v30, 6.0 }
  0xd9   : > { %v480_v29 = vpop.f32.mrf.mxu0 }
  0xda   : > { %v2623_v31 = vmin.f32 %v509_v27, 6.0  ;;  %v481_v32 = vadd.f32 %v2618_v22, %v480_v29  ;;  %v512_v38 = vmax.f32 %v486_v28, 0.0 }
  0xdb   : > { %v2392_v35 = vpop.f32.mrf.mxu0 }
  0xdc   : > { %v511_v36 = vmax.f32 %v481_v32, 0.0  ;;  %2174 = vmatmul.mubr.msk.f32.vlgmr.msra.gmra.mxu0 %vm599_vm1, %v2623_v31  ;;  %v2657_v48 = vmin.f32 %v512_v38, 6.0  ;;  %v496_v49 = vadd.f32 %v2392_v35, %v2618_v22  ;;  %v2819_v35 = vld [vmem:[%s3494_s4] sm:$0xff] }
  0xdd   : > { %762 = vmatpush1.msra.mxu0 %v551_v33  ;;  %694 = vmatprep.mubr.f32.mxu0 %v2491_v18  ;;  %v490_v40 = vpop.f32.mrf.mxu0 }
  0xde   : > { %v2643_v42 = vmin.f32 %v511_v36, 6.0  ;;  %763 = vmatprep.subr.mxu0 %v544_v34  ;;  %v491_v44 = vadd.f32 %v2618_v22, %v490_v40  ;;  %v514_v56 = vmax.f32 %v496_v49, 0.0 }
  0xdf   : > { %764 = vmatpush1.msra.mxu0 %v543_v37  ;;  %v2395_v46 = vpop.f32.mrf.mxu0 }
  0xe0   : > { %765 = vmatprep.subr.mxu0 %v536_v39  ;;  %2175 = vmatmul.mubr.msk.f32.gmra.mxu0 %vm599_vm1, %v2641_v41  ;;  %v513_v50 = vmax.f32 %v491_v44, 0.0  ;;  %v2699_v63 = vmin.f32 %v514_v56, 6.0  ;;  %v506_v0 = vadd.f32 %v2395_v46, %v2618_v22 }
  0xe1   : > { %2176 = vmatmul.mubr.msk.f32.vlgmr.msra.gmra.mxu1 %vm599_vm1, %v2643_v42  ;;  %766 = vmatpush1.msra.mxu0 %v535_v43  ;;  %v500_v53 = vpop.f32.mrf.mxu0 }
  0xe2   : > { %767 = vmatprep.subr.mxu0 %v528_v45  ;;  %706 = vmatprep.mubr.f32.mxu1 %v2491_v18  ;;  %v2678_v57 = vmin.f32 %v513_v50, 6.0  ;;  %v501_v58 = vadd.f32 %v2618_v22, %v500_v53  ;;  %v516_v6 = vmax.f32 %v506_v0, 0.0  ;;  %v559_v22 = vlaneseq }
  0xe3   : > { %768 = vmatpush1.msra.mxu0 %v527_v47  ;;  %801 = vmatprep.mubr.f32.mxu0 %v2491_v18 }
  0xe4   : > { %987 = vmatprep.subr.mxu0 %v556_v51  ;;  %2182 = vmatmul.mubr.msk.f32.vlgmr.msra.gmra.mxu0 %vm599_vm1, %v2623_v31  ;;  %v515_v1 = vmax.f32 %v501_v58, 0.0  ;;  %v524_v11 = vmin.f32 %v516_v6, 6.0  ;;  %v2808_v27 = vshrl.u32 %v559_v22, 7 }
  0xe5   : > { %2177 = vmatmul.mubr.msk.f32.gmra.mxu1 %vm599_vm1, %v2657_v48  ;;  %988 = vmatpush1.msra.mxu0 %v555_v52 }
  0xe6   : > { %712 = vmatprep.mubr.f32.mxu1 %v2491_v18  ;;  %807 = vmatprep.mubr.f32.mxu0 %v2491_v18  ;;  %v523_v7 = vmin.f32 %v515_v1, 6.0  ;;  %v561_v33 = vsub.s32 0, %v2808_v27  ;;  %v573_v58 = vsub.s32 3, %v2808_v27 }
  0xe7   : > { %989 = vmatprep.subr.mxu0 %v548_v54  ;;  %875 = vmatpush1.msra.mxu1 %v553_v55  ;;  %v569_v54 = vsub.s32 2, %v2808_v27 }
  0xe8   : > { %2183 = vmatmul.mubr.msk.f32.gmra.mxu0 %vm599_vm1, %v2641_v41  ;;  %876 = vmatprep.subr.mxu1 %v546_v59  ;;  %v562_v40 = vrot.slane %v2819_v35, %v561_v33 }
  0xe9   : > { %2178 = vmatmul.mubr.msk.f32.gmra.mxu1 %vm599_vm1, %v2678_v57  ;;  %813 = vmatprep.mubr.f32.mxu0 %v2491_v18 }
  0xea   : > { %718 = vmatprep.mubr.f32.mxu1 %v2491_v18  ;;  %990 = vmatpush1.msra.mxu0 %v547_v60 }
  0xeb   : > { %877 = vmatpush1.msra.mxu1 %v545_v61  ;;  %991 = vmatprep.subr.mxu0 %v540_v62 }
  0xec   : > { %2184 = vmatmul.mubr.msk.f32.gmra.mxu0 %vm599_vm1, %v2643_v42  ;;  %878 = vmatprep.subr.mxu1 %v538_v2 }
  0xed   : > { %2179 = vmatmul.mubr.msk.f32.gmra.mxu1 %vm599_vm1, %v2699_v63  ;;  %819 = vmatprep.mubr.f32.mxu0 %v2491_v18 }
  0xee   : > { %724 = vmatprep.mubr.f32.mxu1 %v2491_v18  ;;  %992 = vmatpush1.msra.mxu0 %v539_v3 }
  0xef   : > { %879 = vmatpush1.msra.mxu1 %v537_v4  ;;  %993 = vmatprep.subr.mxu0 %v532_v5 }
  0xf0   : > { %2185 = vmatmul.mubr.msk.f32.gmra.mxu0 %vm599_vm1, %v2657_v48  ;;  %880 = vmatprep.subr.mxu1 %v530_v8  ;;  %v2846_v8 = vrot.slane %v2819_v35, %v569_v54 }
  0xf1   : > { %2180 = vmatmul.mubr.msk.f32.gmra.mxu1 %vm599_vm1, %v523_v7  ;;  %825 = vmatprep.mubr.f32.mxu0 %v2491_v18 }
  0xf2   : > { %730 = vmatprep.mubr.f32.mxu1 %v2491_v18  ;;  %881 = vmatpush1.msra.mxu1 %v529_v9 }
  0xf3   : > { %994 = vmatpush1.msra.mxu0 %v531_v10 }
  0xf4   : > { %2186 = vmatmul.mubr.msk.f32.gmra.mxu0 %vm599_vm1, %v2678_v57 }
  0xf5   : > { %2181 = vmatmul.mubr.msk.f32.gmra.mxu1 %vm599_vm1, %v524_v11  ;;  %831 = vmatprep.mubr.f32.mxu0 %v2491_v18 }
  0xf6   : > { %914 = vmatprep.mubr.f32.mxu1 %v2491_v18 }
  0xf8   : > { %2187 = vmatmul.mubr.msk.f32.gmra.mxu0 %vm599_vm1, %v2699_v63 }
  0xf9   : > { %2190 = vmatmul.mubr.msk.f32.vlgmr.msra.gmra.mxu1 %vm599_vm1, %v2623_v31  ;;  %837 = vmatprep.mubr.f32.mxu0 %v2491_v18 }
  0xfa   : > { %920 = vmatprep.mubr.f32.mxu1 %v2491_v18 }
  0xfc   : > { %2188 = vmatmul.mubr.msk.f32.gmra.mxu0 %vm599_vm1, %v523_v7 }
  0xfd   : > { %2191 = vmatmul.mubr.msk.f32.gmra.mxu1 %vm599_vm1, %v2641_v41  ;;  %843 = vmatprep.mubr.f32.mxu0 %v2491_v18 }
  0xfe   : > { %926 = vmatprep.mubr.f32.mxu1 %v2491_v18 }
 0x100   : > { %2189 = vmatmul.mubr.msk.f32.gmra.mxu0 %vm599_vm1, %v524_v11 }
 0x101   : > { %2192 = vmatmul.mubr.msk.f32.gmra.mxu1 %vm599_vm1, %v2643_v42  ;;  %1027 = vmatprep.mubr.f32.mxu0 %v2491_v18 }
 0x102   : > { %932 = vmatprep.mubr.f32.mxu1 %v2491_v18 }
 0x104   : > { %2198 = vmatmul.mubr.msk.f32.vlgmr.msra.gmra.mxu0 %vm599_vm1, %v2623_v31  ;;  %v565_v31 = vsub.s32 1, %v2808_v27 }
 0x105   : > { %2193 = vmatmul.mubr.msk.f32.gmra.mxu1 %vm599_vm1, %v2657_v48  ;;  %1033 = vmatprep.mubr.f32.mxu0 %v2491_v18 }
 0x106   : > { %938 = vmatprep.mubr.f32.mxu1 %v2491_v18  ;;  %v566_v38 = vrot.slane %v2819_v35, %v565_v31 }
 0x108   : > { %2199 = vmatmul.mubr.msk.f32.gmra.mxu0 %vm599_vm1, %v2641_v41 }
 0x109   : > { %2194 = vmatmul.mubr.msk.f32.gmra.mxu1 %vm599_vm1, %v2678_v57  ;;  %1039 = vmatprep.mubr.f32.mxu0 %v2491_v18 }
 0x10a   : > { %944 = vmatprep.mubr.f32.mxu1 %v2491_v18 }
 0x10c   : > { %2200 = vmatmul.mubr.msk.f32.gmra.mxu0 %vm599_vm1, %v2643_v42 }
 0x10d   : > { %2195 = vmatmul.mubr.msk.f32.gmra.mxu1 %vm599_vm1, %v2699_v63  ;;  %1045 = vmatprep.mubr.f32.mxu0 %v2491_v18 }
 0x10e   : > { %950 = vmatprep.mubr.f32.mxu1 %v2491_v18 }
 0x110   : > { %2201 = vmatmul.mubr.msk.f32.gmra.mxu0 %vm599_vm1, %v2657_v48 }
 0x111   : > { %2196 = vmatmul.mubr.msk.f32.gmra.mxu1 %vm599_vm1, %v523_v7  ;;  %1051 = vmatprep.mubr.f32.mxu0 %v2491_v18 }
 0x112   : > { %956 = vmatprep.mubr.f32.mxu1 %v2491_v18 }
 0x114   : > { %2202 = vmatmul.mubr.msk.f32.gmra.mxu0 %vm599_vm1, %v2678_v57 }
 0x115   : > { %2197 = vmatmul.mubr.msk.f32.gmra.mxu1 %vm599_vm1, %v524_v11  ;;  %1057 = vmatprep.mubr.f32.mxu0 %v2491_v18 }
 0x116   : > { %1273 = vmatprep.mubr.f32.mxu1 %v2491_v18 }
 0x118   : > { %2203 = vmatmul.mubr.msk.f32.gmra.mxu0 %vm599_vm1, %v2699_v63 }
 0x119   : > { %1063 = vmatprep.mubr.f32.mxu0 %v2491_v18 }
 0x11c   : > { %2204 = vmatmul.mubr.msk.f32.gmra.mxu0 %vm599_vm1, %v523_v7 }
 0x11d   : > { %1069 = vmatprep.mubr.f32.mxu0 %v2491_v18 }
 0x120   : > { %2205 = vmatmul.mubr.msk.f32.gmra.mxu0 %vm599_vm1, %v524_v11 }
 0x121   : > { %1344 = vmatprep.mubr.f32.mxu0 %v2491_v18 }
 0x19c   : > { %v690_v12 = vpop.f32.mrf.mxu0 }
 0x19d   : > { %v2839_v62 = vadd.f32 %v690_v12, %v562_v40 }
 0x19e   : > { %v2794_v13 = vpop.f32.mrf.mxu0 }
 0x1a0   : > { %v696_v14 = vpop.f32.mrf.mxu0 }
 0x1a1   : > { %v2796_v15 = vpop.f32.mrf.mxu1  ;;  %v2850_v12 = vadd.f32 %v696_v14, %v562_v40  ;;  %v693_v14 = vadd.f32 %v2794_v13, %v566_v38 }
 0x1a2   : > { %v2798_v16 = vpop.f32.mrf.mxu0 }
 0x1a3   : > { %v704_v17 = vpop.f32.mrf.mxu1 }
 0x1a4   : > { %v2800_v19 = vpop.f32.mrf.mxu0  ;;  %v705_v22 = vadd.f32 %v704_v17, %v566_v38  ;;  %v699_v17 = vadd.f32 %v2798_v16, %v566_v38 }
 0x1a5   : > { %v708_v20 = vpop.f32.mrf.mxu1 }
 0x1a6   : > { %v2802_v21 = vpop.f32.mrf.mxu0  ;;  %v709_v7 = vadd.f32 %v708_v20, %v562_v40 }
 0x1a7   : > { %v710_v23 = vpop.f32.mrf.mxu1 }
 0x1a8   : > { %v2804_v24 = vpop.f32.mrf.mxu0  ;;  %v711_v2 = vadd.f32 %v710_v23, %v566_v38  ;;  %v2855_v23 = vrot.slane %v2819_v35, %v573_v58 }
 0x1a9   : > { %v714_v25 = vpop.f32.mrf.mxu1 }
 0x1aa   : > { %v2806_v26 = vpop.f32.mrf.mxu0  ;;  %v715_v63 = vadd.f32 %v714_v25, %v562_v40 }
 0x1ab   : > { %v716_v28 = vpop.f32.mrf.mxu1 }
 0x1ac   : > { %v2810_v29 = vpop.f32.mrf.mxu0  ;;  %v717_v59 = vadd.f32 %v716_v28, %v566_v38  ;;  %v1076_v28 = vmax.f32 %v2839_v62, 0.0  ;;  %v806_v62 = vadd.f32 %v2802_v21, %v2855_v23 }
 0x1ad   : > { %v720_v30 = vpop.f32.mrf.mxu1 }
 0x1ae   : > { %v2813_v32 = vpop.f32.mrf.mxu0  ;;  %v721_v55 = vadd.f32 %v720_v30, %v562_v40  ;;  %v1109_v25 = vmax.f32 %v717_v59, 0.0  ;;  %v703_v30 = vadd.f32 %v2796_v15, %v562_v40  ;;  %v1084_v15 = vmax.f32 %v2850_v12, 0.0 }
 0x1af   : > { %v722_v34 = vpop.f32.mrf.mxu1 }
 0x1b0   : > { %v2821_v36 = vpop.f32.mrf.mxu0  ;;  %v723_v49 = vadd.f32 %v722_v34, %v566_v38  ;;  %v1116_v9 = vmax.f32 %v721_v55, 0.0  ;;  %v1108_v34 = vmax.f32 %v715_v63, 0.0 }
 0x1b1   : > { %v726_v37 = vpop.f32.mrf.mxu1 }
 0x1b2   : > { %v2826_v39 = vpop.f32.mrf.mxu0  ;;  %v727_v44 = vadd.f32 %v726_v37, %v562_v40  ;;  %v1117_v3 = vmax.f32 %v723_v49, 0.0 }
 0x1b3   : > { %v728_v41 = vpop.f32.mrf.mxu1 }
 0x1b4   : > { %v729_v42 = vadd.f32 %v728_v41, %v566_v38  ;;  %v2831_v43 = vpop.f32.mrf.mxu0  ;;  %v1124_v56 = vmax.f32 %v727_v44, 0.0  ;;  %v1101_v41 = vmax.f32 %v711_v2, 0.0 }
 0x1b5   : > { %v732_v45 = vpop.f32.mrf.mxu1  ;;  %v828_v12 = vadd.f32 %v2831_v43, %v2846_v8 }
 0x1b6   : > { %v733_v46 = vadd.f32 %v732_v45, %v562_v40  ;;  %v2833_v47 = vpop.f32.mrf.mxu0  ;;  %v1125_v50 = vmax.f32 %v729_v42, 0.0  ;;  %v1188_v10 = vmin.f32 %v1124_v56, 6.0  ;;  %v1181_v42 = vmin.f32 %v1117_v3, 6.0 }
 0x1b7   : > { %v734_v48 = vpop.f32.mrf.mxu1  ;;  %v1100_v45 = vmax.f32 %v709_v7, 0.0  ;;  %v1093_v40 = vmax.f32 %v705_v22, 0.0  ;;  %v1165_v63 = vmin.f32 %v1101_v41, 6.0 }
 0x1b8   : > { %v1132_v51 = vmax.f32 %v733_v46, 0.0  ;;  %v735_v52 = vadd.f32 %v734_v48, %v566_v38  ;;  %v833_v53 = vpop.f32.mrf.mxu0  ;;  %v1189_v4 = vmin.f32 %v1125_v50, 6.0  ;;  %v1180_v46 = vmin.f32 %v1116_v9, 6.0 }
 0x1b9   : > { %v2836_v57 = vpop.f32.mrf.mxu1  ;;  %v1092_v38 = vmax.f32 %v703_v30, 0.0  ;;  %v1077_v9 = vmax.f32 %v693_v14, 0.0  ;;  %v822_v14 = vadd.f32 %v2821_v36, %v2846_v8  ;;  %v1110_v36 = vmax.f32 %v828_v12, 0.0 }
 0x1ba   : > { %v1133_v60 = vmax.f32 %v735_v52, 0.0  ;;  %v835_v61 = vpop.f32.mrf.mxu0  ;;  %v1196_v0 = vmin.f32 %v1132_v51, 6.0  ;;  %v1173_v51 = vmin.f32 %v1109_v25, 6.0  ;;  %v1172_v52 = vmin.f32 %v1108_v34, 6.0 }
 0x1bb   : > { %v2841_v1 = vpop.f32.mrf.mxu1  ;;  %v836_v55 = vadd.f32 %v835_v61, %v2855_v23  ;;  %v1156_v25 = vmin.f32 %v1092_v38, 6.0  ;;  %v1079_v12 = vmax.f32 %v806_v62, 0.0 }
 0x1bc   : > { %v1197_v5 = vmin.f32 %v1133_v60, 6.0  ;;  %v839_v6 = vpop.f32.mrf.mxu0  ;;  %v1085_v60 = vmax.f32 %v699_v17, 0.0 }
 0x1bd   : > { %v2848_v11 = vpop.f32.mrf.mxu1  ;;  %v840_v13 = vadd.f32 %v839_v6, %v2846_v8  ;;  %v1119_v30 = vmax.f32 %v836_v55, 0.0  ;;  %v1102_v55 = vmax.f32 %v822_v14, 0.0 }
 0x1be   : > { %1225 = vmatprep.subr.mxu1 %v1197_v5  ;;  %v841_v20 = vpop.f32.mrf.mxu0  ;;  %v830_v5 = vadd.f32 %v2833_v47, %v2855_v23  ;;  %v1149_v17 = vmin.f32 %v1085_v60, 6.0 }
 0x1bf   : > { %v2859_v37 = vpop.f32.mrf.mxu1  ;;  %1226 = vmatpush1.msra.mxu1 %v1196_v0  ;;  %v842_v48 = vadd.f32 %v841_v20, %v2855_v23  ;;  %v834_v0 = vadd.f32 %v833_v53, %v2846_v8  ;;  %v1126_v22 = vmax.f32 %v840_v13, 0.0  ;;  %v824_v20 = vadd.f32 %v2826_v39, %v2855_v23 }
 0x1c0   : > { %1227 = vmatprep.subr.mxu1 %v1189_v4  ;;  %v845_v44 = vpop.f32.mrf.mxu0  ;;  %v1164_v4 = vmin.f32 %v1100_v45, 6.0  ;;  %v818_v45 = vadd.f32 %v2813_v32, %v2855_v23  ;;  %v812_v32 = vadd.f32 %v2806_v26, %v2855_v23  ;;  %v1183_v38 = vmin.f32 %v1119_v30, 6.0 }
 0x1c1   : > { %v846_v49 = vadd.f32 %v845_v44, %v2846_v8  ;;  %v2865_v50 = vpop.f32.mrf.mxu1  ;;  %1228 = vmatpush1.msra.mxu1 %v1188_v10  ;;  %v1127_v6 = vmax.f32 %v842_v48, 0.0  ;;  %v1157_v10 = vmin.f32 %v1093_v40, 6.0  ;;  %v1118_v41 = vmax.f32 %v834_v0, 0.0 }
 0x1c2   : > { %1229 = vmatprep.subr.mxu1 %v1181_v42  ;;  %v847_v16 = vpop.f32.mrf.mxu0  ;;  %v1148_v44 = vmin.f32 %v1084_v15, 6.0  ;;  %v816_v40 = vadd.f32 %v2810_v29, %v2846_v8  ;;  %v1140_v15 = vmin.f32 %v1076_v28, 6.0  ;;  %v810_v29 = vadd.f32 %v2804_v24, %v2846_v8 }
 0x1c3   : > { %v848_v56 = vadd.f32 %v847_v16, %v2855_v23  ;;  %v2871_v59 = vpop.f32.mrf.mxu1  ;;  %1230 = vmatpush1.msra.mxu1 %v1180_v46  ;;  %v1134_v2 = vmax.f32 %v846_v49, 0.0  ;;  %v1111_v46 = vmax.f32 %v830_v5, 0.0  ;;  %v1191_v39 = vmin.f32 %v1127_v6, 6.0 }
 0x1c4   : > { %1231 = vmatprep.subr.mxu1 %v1173_v51  ;;  %v2874_v3 = vpop.f32.mrf.mxu0  ;;  %v1141_v49 = vmin.f32 %v1077_v9, 6.0  ;;  %v1190_v51 = vmin.f32 %v1126_v22, 6.0  ;;  %v1103_v16 = vmax.f32 %v824_v20, 0.0  ;;  %v1095_v28 = vmax.f32 %v818_v45, 0.0 }
 0x1c5   : > { %v1135_v61 = vmax.f32 %v848_v56, 0.0  ;;  %v2878_v7 = vpop.f32.mrf.mxu1  ;;  %1232 = vmatpush1.msra.mxu1 %v1172_v52  ;;  %v1198_v42 = vmin.f32 %v1134_v2, 6.0  ;;  %v1182_v56 = vmin.f32 %v1118_v41, 6.0  ;;  %v1175_v26 = vmin.f32 %v1111_v46, 6.0 }
 0x1c6   : > { %1233 = vmatprep.subr.mxu1 %v1165_v63  ;;  %v2882_v53 = vpop.f32.mrf.mxu0  ;;  %v804_v0 = vadd.f32 %v2800_v19, %v2846_v8  ;;  %v1094_v2 = vmax.f32 %v816_v40, 0.0  ;;  %v2492_v5 = vmov 1.0   ;;  %v1087_v6 = vmax.f32 %v812_v32, 0.0 }
 0x1c7   : > { %v1199_v47 = vmin.f32 %v1135_v61, 6.0  ;;  %v2886_v34 = vpop.f32.mrf.mxu1  ;;  %1234 = vmatpush1.msra.mxu1 %v1164_v4  ;;  %v1174_v4 = vmin.f32 %v1110_v36, 6.0  ;;  %v1167_v61 = vmin.f32 %v1103_v16, 6.0  ;;  %v1086_v23 = vmax.f32 %v810_v29, 0.0 }
 0x1c8   : > { %1235 = vmatprep.subr.mxu1 %v1157_v10  ;;  %v2890_v43 = vpop.f32.mrf.mxu0  ;;  %v1166_v9 = vmin.f32 %v1102_v55, 6.0  ;;  %v577_v10 = vsub.s32 4, %v2808_v27  ;;  %v581_v19 = vsub.s32 5, %v2808_v27  ;;  %v1159_v22 = vmin.f32 %v1095_v28, 6.0 }
 0x1c9   : > { %v2894_v48 = vpop.f32.mrf.mxu1  ;;  %1236 = vmatpush1.msra.mxu1 %v1156_v25  ;;  %1296 = vmatprep.subr.mxu0 %v1199_v47  ;;  %v1078_v20 = vmax.f32 %v804_v0, 0.0  ;;  %v1158_v30 = vmin.f32 %v1094_v2, 6.0  ;;  %v1150_v41 = vmin.f32 %v1086_v23, 6.0  ;;  %v1143_v46 = vmin.f32 %v1079_v12, 6.0 }
 0x1ca   : > { %1237 = vmatprep.subr.mxu1 %v1149_v17  ;;  %v2898_v13 = vpop.f32.mrf.mxu0  ;;  %1297 = vmatpush1.msra.mxu0 %v1198_v42  ;;  %v1151_v17 = vmin.f32 %v1087_v6, 6.0  ;;  %v578_v42 = vrot.slane %v2819_v35, %v577_v10  ;;  %v585_v16 = vsub.s32 6, %v2808_v27 }
 0x1cb   : > { %v2904_v52 = vpop.f32.mrf.mxu1  ;;  %1238 = vmatpush1.msra.mxu1 %v1148_v44  ;;  %1298 = vmatprep.subr.mxu0 %v1191_v39  ;;  %v582_v44 = vrot.slane %v2819_v35, %v581_v19 }
 0x1cc   : > { %1239 = vmatprep.subr.mxu1 %v1141_v49  ;;  %v2908_v60 = vpop.f32.mrf.mxu0  ;;  %1299 = vmatpush1.msra.mxu0 %v1190_v51  ;;  %v1142_v49 = vmin.f32 %v1078_v20, 6.0  ;;  %v2942_v6 = vadd.f32 %v2836_v57, %v578_v42  ;;  %v923_v20 = vadd.f32 %v2848_v11, %v578_v42 }
 0x1cd   : > { %v946_v63 = vpop.f32.mrf.mxu1  ;;  %1240 = vmatpush1.msra.mxu1 %v1140_v15  ;;  %1300 = vmatprep.subr.mxu0 %v1183_v38  ;;  %v937_v23 = vadd.f32 %v2886_v34, %v582_v44 }
 0x1ce   : > { %v2914_v24 = vpop.f32.mrf.mxu0  ;;  %1301 = vmatpush1.msra.mxu0 %v1182_v56  ;;  %2206 = vmatmul.mubr.msk.f32.vlgmr.msra.gmra.mxu1 %vm1205_vm2, %v2492_v5  ;;  %v589_v56 = vsub.s32 7, %v2808_v27  ;;  %v947_v62 = vadd.f32 %v946_v63, %v578_v42  ;;  %v2948_v63 = vrot.slane %v2819_v35, %v585_v16 }
 0x1cf   : > { %v948_v21 = vpop.f32.mrf.mxu1  ;;  %1302 = vmatprep.subr.mxu0 %v1175_v26  ;;  %1415 = vmatprep.mubr.f32.mxu1 %v2491_v18  ;;  %v943_v26 = vadd.f32 %v2904_v52, %v582_v44 }
 0x1d0   : > { %v2921_v8 = vpop.f32.mrf.mxu0  ;;  %1303 = vmatpush1.msra.mxu0 %v1174_v4  ;;  %v949_v38 = vadd.f32 %v948_v21, %v582_v44  ;;  %v2955_v57 = vrot.slane %v2819_v35, %v589_v56  ;;  %v919_v35 = vadd.f32 %v2841_v1, %v582_v44 }
 0x1d1   : > { %v952_v25 = vpop.f32.mrf.mxu1  ;;  %1304 = vmatprep.subr.mxu0 %v1167_v61  ;;  %v941_v61 = vadd.f32 %v2894_v48, %v578_v42 }
 0x1d2   : > { %v2923_v47 = vpop.f32.mrf.mxu0  ;;  %1305 = vmatpush1.msra.mxu0 %v1166_v9  ;;  %v953_v15 = vadd.f32 %v952_v25, %v578_v42  ;;  %v1121_v9 = vmax.f32 %v949_v38, 0.0  ;;  %v1120_v25 = vmax.f32 %v947_v62, 0.0 }
 0x1d3   : > { %v954_v14 = vpop.f32.mrf.mxu1  ;;  %1306 = vmatprep.subr.mxu0 %v1159_v22  ;;  %v935_v22 = vadd.f32 %v2878_v7, %v578_v42  ;;  %v1112_v7 = vmax.f32 %v941_v61, 0.0 }
 0x1d4   : > { %v2931_v45 = vpop.f32.mrf.mxu0  ;;  %1307 = vmatpush1.msra.mxu0 %v1158_v30  ;;  %v955_v40 = vadd.f32 %v954_v14, %v582_v44  ;;  %v1128_v21 = vmax.f32 %v953_v15, 0.0  ;;  %v931_v30 = vadd.f32 %v2871_v59, %v582_v44  ;;  %v1184_v15 = vmin.f32 %v1120_v25, 6.0 }
 0x1d5   : > { %v958_v39 = vpop.f32.mrf.mxu1  ;;  %1308 = vmatprep.subr.mxu0 %v1151_v17  ;;  %v1113_v17 = vmax.f32 %v943_v26, 0.0  ;;  %v1104_v59 = vmax.f32 %v935_v22, 0.0  ;;  %v1081_v22 = vmax.f32 %v919_v35, 0.0 }
 0x1d6   : > { %v959_v36 = vadd.f32 %v958_v39, %v578_v42  ;;  %v2933_v51 = vpop.f32.mrf.mxu0  ;;  %1309 = vmatpush1.msra.mxu0 %v1150_v41  ;;  %v1129_v0 = vmax.f32 %v955_v40, 0.0  ;;  %v1080_v41 = vmax.f32 %v2942_v6, 0.0  ;;  %v1192_v39 = vmin.f32 %v1128_v21, 6.0 }
 0x1d7   : > { %v960_v32 = vpop.f32.mrf.mxu1  ;;  %1310 = vmatprep.subr.mxu0 %v1143_v46  ;;  %v929_v46 = vadd.f32 %v2865_v50, %v578_v42  ;;  %v1105_v40 = vmax.f32 %v937_v23, 0.0  ;;  %v1097_v50 = vmax.f32 %v931_v30, 0.0  ;;  %v1177_v42 = vmin.f32 %v1113_v17, 6.0 }
 0x1d8   : > { %v961_v29 = vadd.f32 %v960_v32, %v582_v44  ;;  %v1059_v55 = vpop.f32.mrf.mxu0  ;;  %1311 = vmatpush1.msra.mxu0 %v1142_v49  ;;  %v1136_v28 = vmax.f32 %v959_v36, 0.0  ;;  %v1193_v14 = vmin.f32 %v1129_v0, 6.0  ;;  %v925_v49 = vadd.f32 %v2859_v37, %v582_v44 }
 0x1d9   : > { %2207 = vmatmul.mubr.msk.f32.vlgmr.msra.gmra.mxu0 %vm1205_vm2, %v2492_v5  ;;  %v1185_v36 = vmin.f32 %v1121_v9, 6.0  ;;  %v1176_v37 = vmin.f32 %v1112_v7, 6.0  ;;  %v1060_v61 = vadd.f32 %v1059_v55, %v2948_v63  ;;  %v1168_v23 = vmin.f32 %v1104_v59, 6.0 }
 0x1da   : > { %v1137_v2 = vmax.f32 %v961_v29, 0.0  ;;  %v1061_v4 = vpop.f32.mrf.mxu0  ;;  %1486 = vmatprep.mubr.f32.mxu0 %v2491_v18  ;;  %v1200_v48 = vmin.f32 %v1136_v28, 6.0  ;;  %v1088_v29 = vmax.f32 %v923_v20, 0.0  ;;  %v1096_v28 = vmax.f32 %v929_v46, 0.0 }
 0x1db   : > { %v1062_v44 = vadd.f32 %v1061_v4, %v2955_v57  ;;  %v1089_v0 = vmax.f32 %v925_v49, 0.0  ;;  %v1056_v9 = vadd.f32 %v2933_v51, %v2955_v57  ;;  %v1161_v25 = vmin.f32 %v1097_v50, 6.0 }
 0x1dc   : > { %v1201_v52 = vmin.f32 %v1137_v2, 6.0  ;;  %v1065_v12 = vpop.f32.mrf.mxu0  ;;  %v1169_v2 = vmin.f32 %v1105_v40, 6.0  ;;  %v1054_v4 = vadd.f32 %v2931_v45, %v2948_v63  ;;  %v1160_v20 = vmin.f32 %v1096_v28, 6.0 }
 0x1dd   : > { %v1066_v62 = vadd.f32 %v1065_v12, %v2948_v63  ;;  %v1050_v55 = vadd.f32 %v2923_v47, %v2955_v57  ;;  %v1123_v30 = vmax.f32 %v1062_v44, 0.0  ;;  %v1048_v51 = vadd.f32 %v2921_v8, %v2948_v63 }
 0x1de   : > { %1367 = vmatprep.subr.mxu1 %v1201_v52  ;;  %v1067_v34 = vpop.f32.mrf.mxu0  ;;  %v1152_v7 = vmin.f32 %v1088_v29, 6.0  ;;  %v1044_v45 = vadd.f32 %v2914_v24, %v2955_v57  ;;  %v1145_v49 = vmin.f32 %v1081_v22, 6.0  ;;  %v1042_v47 = vadd.f32 %v2908_v60, %v2948_v63  ;;  %v1619_v22 = vld [vmem:[%s3495_s5 + $0x1e8] sm:$0xff] }
 0x1df   : > { %1368 = vmatpush1.msra.mxu1 %v1200_v48  ;;  %v1068_v32 = vadd.f32 %v1067_v34, %v2955_v57  ;;  %v1130_v48 = vmax.f32 %v1066_v62, 0.0  ;;  %v1122_v34 = vmax.f32 %v1060_v61, 0.0  ;;  %v1114_v40 = vmax.f32 %v1054_v4, 0.0  ;;  %v1573_v61 = vld [vmem:[%s3495_s5 + $0x78] sm:$0xff]  ;;  %v1603_v4 = vld [vmem:[%s3495_s5 + $0x168] sm:$0xff] }
 0x1e0   : > { %1369 = vmatprep.subr.mxu1 %v1193_v14  ;;  %v1071_v11 = vpop.f32.mrf.mxu0  ;;  %v1153_v14 = vmin.f32 %v1089_v0, 6.0  ;;  %v1144_v8 = vmin.f32 %v1080_v41, 6.0  ;;  %v1107_v59 = vmax.f32 %v1050_v55, 0.0  ;;  %v1187_v24 = vmin.f32 %v1123_v30, 6.0  ;;  %v1589_v0 = vld [vmem:[%s3495_s5 + $0xf8] sm:$0xff]  ;;  %v1570_v55 = vld [vmem:[%s3495_s5 + $0x60] sm:$0xff] }
 0x1e1   : > { %v1072_v38 = vadd.f32 %v1071_v11, %v2948_v63  ;;  %1370 = vmatpush1.msra.mxu1 %v1192_v39  ;;  %v1131_v52 = vmax.f32 %v1068_v32, 0.0  ;;  %v1115_v39 = vmax.f32 %v1056_v9, 0.0  ;;  %v1038_v11 = vadd.f32 %v2898_v13, %v2955_v57  ;;  %v1572_v9 = vld [vmem:[%s3495_s5 + $0x70] sm:$0xff]  ;;  %v1602_v30 = vld [vmem:[%s3495_s5 + $0x160] sm:$0xff] }
 0x1e2   : > { %1371 = vmatprep.subr.mxu1 %v1185_v36  ;;  %v1073_v1 = vpop.f32.mrf.mxu0  ;;  %v1194_v36 = vmin.f32 %v1130_v48, 6.0  ;;  %v1106_v32 = vmax.f32 %v1048_v51, 0.0  ;;  %v1032_v60 = vadd.f32 %v2882_v53, %v2955_v57  ;;  %v1099_v29 = vmax.f32 %v1044_v45, 0.0  ;;  %v1586_v48 = vld [vmem:[%s3495_s5 + $0xe0] sm:$0xff]  ;;  %v1569_v51 = vld [vmem:[%s3495_s5 + $0x58] sm:$0xff]  ;;  %v1568_v45 = vld [vmem:[%s3495_s5 + $0x50] sm:$0xff] }
 0x1e3   : > { %v1074_v26 = vadd.f32 %v1073_v1, %v2955_v57  ;;  %1372 = vmatpush1.msra.mxu1 %v1184_v15  ;;  %v1138_v21 = vmax.f32 %v1072_v38, 0.0  ;;  %v1195_v35 = vmin.f32 %v1131_v52, 6.0  ;;  %v1036_v15 = vadd.f32 %v2890_v43, %v2948_v63  ;;  %v1604_v52 = vld [vmem:[%s3495_s5 + $0x170] sm:$0xff] }
 0x1e4   : > { %1373 = vmatprep.subr.mxu1 %v1177_v42  ;;  %v1186_v38 = vmin.f32 %v1122_v34, 6.0  ;;  %v1179_v6 = vmin.f32 %v1115_v39, 6.0  ;;  %v1030_v13 = vadd.f32 %v2874_v3, %v2948_v63  ;;  %v1098_v41 = vmax.f32 %v1042_v47, 0.0  ;;  %v1601_v34 = vld [vmem:[%s3495_s5 + $0x158] sm:$0xff]  ;;  %v1600_v39 = vld [vmem:[%s3495_s5 + $0x150] sm:$0xff]  ;;  %v1567_v47 = vld [vmem:[%s3495_s5 + $0x48] sm:$0xff] }
 0x1e5   : > { %v1139_v12 = vmax.f32 %v1074_v26, 0.0  ;;  %1374 = vmatpush1.msra.mxu1 %v1176_v37  ;;  %v1202_v46 = vmin.f32 %v1138_v21, 6.0  ;;  %v1178_v50 = vmin.f32 %v1114_v40, 6.0  ;;  %v1091_v43 = vmax.f32 %v1038_v11, 0.0  ;;  %v1605_v21 = vld [vmem:[%s3495_s5 + $0x178] sm:$0xff]  ;;  %v1599_v40 = vld [vmem:[%s3495_s5 + $0x148] sm:$0xff] }
 0x1e6   : > { %1375 = vmatprep.subr.mxu1 %v1169_v2  ;;  %v1171_v42 = vmin.f32 %v1107_v59, 6.0  ;;  %v1090_v62 = vmax.f32 %v1036_v15, 0.0  ;;  %v1170_v1 = vmin.f32 %v1106_v32, 6.0  ;;  %v1083_v53 = vmax.f32 %v1032_v60, 0.0  ;;  %v1621_v2 = vld [vmem:[%s3495_s5 + $0x1f8] sm:$0xff]  ;;  %v1566_v11 = vld [vmem:[%s3495_s5 + $0x40] sm:$0xff] }
 0x1e7   : > { %v1203_v17 = vmin.f32 %v1139_v12, 6.0  ;;  %1376 = vmatpush1.msra.mxu1 %v1168_v23  ;;  %v1163_v57 = vmin.f32 %v1099_v29, 6.0  ;;  %v1082_v28 = vmax.f32 %v1030_v13, 0.0  ;;  %v1162_v37 = vmin.f32 %v1098_v41, 6.0  ;;  %v1620_v23 = vld [vmem:[%s3495_s5 + $0x1f0] sm:$0xff]  ;;  %v1587_v12 = vld [vmem:[%s3495_s5 + $0xe8] sm:$0xff] }
 0x1e8   : > { %1377 = vmatprep.subr.mxu1 %v1161_v25  ;;  %v1155_v44 = vmin.f32 %v1091_v43, 6.0  ;;  %v1154_v3 = vmin.f32 %v1090_v62, 6.0  ;;  %v1147_v63 = vmin.f32 %v1083_v53, 6.0  ;;  %v1571_v25 = vld [vmem:[%s3495_s5 + $0x68] sm:$0xff]  ;;  %v1598_v59 = vld [vmem:[%s3495_s5 + $0x140] sm:$0xff]  ;;  %v1613_v15 = vld [vmem:[%s3495_s5 + $0x1b8] sm:$0xff] }
 0x1e9   : > { %1378 = vmatpush1.msra.mxu1 %v1160_v20  ;;  %1438 = vmatprep.subr.mxu0 %v1203_v17  ;;  %v1146_v26 = vmin.f32 %v1082_v28, 6.0  ;;  %v1618_v20 = vld [vmem:[%s3495_s5 + $0x1e0] sm:$0xff]  ;;  %v1585_v17 = vld [vmem:[%s3495_s5 + $0xd8] sm:$0xff]  ;;  %v1580_v60 = vld [vmem:[%s3495_s5 + $0xb0] sm:$0xff] }
 0x1ea   : > { %1379 = vmatprep.subr.mxu1 %v1153_v14  ;;  %1439 = vmatpush1.msra.mxu0 %v1202_v46  ;;  %v1617_v14 = vld [vmem:[%s3495_s5 + $0x1d8] sm:$0xff]  ;;  %v1584_v46 = vld [vmem:[%s3495_s5 + $0xd0] sm:$0xff]  ;;  %v1579_v41 = vld [vmem:[%s3495_s5 + $0xa8] sm:$0xff] }
 0x1eb   : > { %1380 = vmatpush1.msra.mxu1 %v1152_v7  ;;  %1440 = vmatprep.subr.mxu0 %v1195_v35  ;;  %v1616_v7 = vld [vmem:[%s3495_s5 + $0x1d0] sm:$0xff]  ;;  %v1583_v35 = vld [vmem:[%s3495_s5 + $0xc8] sm:$0xff]  ;;  %v1565_v32 = vld [vmem:[%s3495_s5 + $0x38] sm:$0xff] }
 0x1ec   : > { %1381 = vmatprep.subr.mxu1 %v1145_v49  ;;  %1441 = vmatpush1.msra.mxu0 %v1194_v36  ;;  %v1615_v49 = vld [vmem:[%s3495_s5 + $0x1c8] sm:$0xff]  ;;  %v1582_v36 = vld [vmem:[%s3495_s5 + $0xc0] sm:$0xff]  ;;  %v1612_v29 = vld [vmem:[%s3495_s5 + $0x1b0] sm:$0xff] }
 0x1ed   : > { %1382 = vmatpush1.msra.mxu1 %v1144_v8  ;;  %1442 = vmatprep.subr.mxu0 %v1187_v24  ;;  %v1614_v8 = vld [vmem:[%s3495_s5 + $0x1c0] sm:$0xff]  ;;  %v1581_v24 = vld [vmem:[%s3495_s5 + $0xb8] sm:$0xff]  ;;  %v1596_v13 = vld [vmem:[%s3495_s5 + $0x130] sm:$0xff] }
 0x1ee   : > { %1443 = vmatpush1.msra.mxu0 %v1186_v38  ;;  %2208 = vmatmul.mubr.msk.f32.vlgmr.msra.gmra.mxu1 %vm1205_vm2, %v2492_v5  ;;  %v1597_v38 = vld [vmem:[%s3495_s5 + $0x138] sm:$0xff]  ;;  %v1563_v43 = vld [vmem:[%s3495_s5 + $0x28] sm:$0xff]  ;;  %v1578_v62 = vld [vmem:[%s3495_s5 + $0xa0] sm:$0xff] }
 0x1ef   : > { %1444 = vmatprep.subr.mxu0 %v1179_v6  ;;  %2223 = vmatprep.subr.mxu1 %v1589_v0  ;;  %v1564_v6 = vld [vmem:[%s3495_s5 + $0x30] sm:$0xff]  ;;  %v1562_v53 = vld [vmem:[%s3495_s5 + $0x20] sm:$0xff]  ;;  %v1577_v28 = vld [vmem:[%s3495_s5 + $0x98] sm:$0xff] }
 0x1f0   : > { %1445 = vmatpush1.msra.mxu0 %v1178_v50  ;;  %2224 = vmatpush3.msra.mxu1 %v1573_v61  ;;  %v1611_v50 = vld [vmem:[%s3495_s5 + $0x1a8] sm:$0xff]  ;;  %v1560_v0 = vld [vmem:[%s3495_s5 + $0x10] sm:$0xff] }
 0x1f1   : > { %1446 = vmatprep.subr.mxu0 %v1171_v42  ;;  %v1595_v42 = vld [vmem:[%s3495_s5 + $0x128] sm:$0xff] }
 0x1f2   : > { %1447 = vmatpush1.msra.mxu0 %v1170_v1  ;;  %v1610_v1 = vld [vmem:[%s3495_s5 + $0x1a0] sm:$0xff]  ;;  %v1575_v61 = vld [vmem:[%s3495_s5 + $0x88] sm:$0xff] }
 0x1f3   : > { %1448 = vmatprep.subr.mxu0 %v1163_v57  ;;  %v1594_v57 = vld [vmem:[%s3495_s5 + $0x120] sm:$0xff] }
 0x1f4   : > { %1449 = vmatpush1.msra.mxu0 %v1162_v37  ;;  %v1609_v37 = vld [vmem:[%s3495_s5 + $0x198] sm:$0xff] }
 0x1f5   : > { %1450 = vmatprep.subr.mxu0 %v1155_v44  ;;  %v1561_v44 = vld [vmem:[%s3495_s5 + $0x18] sm:$0xff] }
 0x1f6   : > { %1451 = vmatpush1.msra.mxu0 %v1154_v3  ;;  %v1593_v3 = vld [vmem:[%s3495_s5 + $0x118] sm:$0xff] }
 0x1f7   : > { %1452 = vmatprep.subr.mxu0 %v1147_v63  ;;  %v1576_v63 = vld [vmem:[%s3495_s5 + $0x90] sm:$0xff] }
 0x1f8   : > { %1453 = vmatpush1.msra.mxu0 %v1146_v26  ;;  %v1608_v26 = vld [vmem:[%s3495_s5 + $0x190] sm:$0xff] }
 0x1f9   : > { %2209 = vmatmul.mubr.msk.f32.vlgmr.msra.gmra.mxu0 %vm1205_vm2, %v2492_v5  ;;  %2258 = vmatprep.subr.mxu0 %v1621_v2  ;;  %v1588_v5 = vld [vmem:[%s3495_s5 + $0xf0] sm:$0xff] }
 0x1fa   : > { %2259 = vmatpush3.msra.mxu0 %v1605_v21  ;;  %2225 = vmatprep.subr.mxu1 %v1588_v5  ;;  %v1592_v2 = vld [vmem:[%s3495_s5 + $0x110] sm:$0xff]  ;;  %v1607_v21 = vld [vmem:[%s3495_s5 + $0x188] sm:$0xff] }
 0x1fb   : > { %2260 = vmatprep.subr.mxu0 %v1620_v23  ;;  %2226 = vmatpush3.msra.mxu1 %v1572_v9  ;;  %v1559_v5 = vld [vmem:[%s3495_s5 + $0x8] sm:$0xff]  ;;  %v1574_v9 = vld [vmem:[%s3495_s5 + $0x80] sm:$0xff] }
 0x1fc   : > { %2261 = vmatpush3.msra.mxu0 %v1604_v52  ;;  %2227 = vmatprep.subr.mxu1 %v1587_v12  ;;  %v1591_v23 = vld [vmem:[%s3495_s5 + $0x108] sm:$0xff]  ;;  %v1606_v52 = vld [vmem:[%s3495_s5 + $0x180] sm:$0xff] }
 0x1fd   : > { %2262 = vmatprep.subr.mxu0 %v1619_v22  ;;  %2228 = vmatpush3.msra.mxu1 %v1571_v25  ;;  %v1558_v12 = vld [vmem:[%s3495_s5] sm:$0xff]  ;;  %v1653_v25 = vld [vmem:[%s3495_s5 + $0x2f8] sm:$0xff] }
 0x1fe   : > { %2263 = vmatpush3.msra.mxu0 %v1603_v4  ;;  %2229 = vmatprep.subr.mxu1 %v1586_v48  ;;  %v1590_v22 = vld [vmem:[%s3495_s5 + $0x100] sm:$0xff]  ;;  %v1685_v4 = vld [vmem:[%s3495_s5 + $0x3f8] sm:$0xff] }
 0x1ff   : > { %2264 = vmatprep.subr.mxu0 %v1618_v20  ;;  %2230 = vmatpush3.msra.mxu1 %v1570_v55  ;;  %v2493_v20 = vmov 1966171168  }
 0x200   : > { %2265 = vmatpush3.msra.mxu0 %v1602_v30  ;;  %2231 = vmatprep.subr.mxu1 %v1585_v17  ;;  %v1506_v55 = vunpack.c.l.s4 %v2493_v20  ;;  %v1662_v20 = vld [vmem:[%s3495_s5 + $0x340] sm:$0xff] }
 0x201   : > { %2266 = vmatprep.subr.mxu0 %v1617_v14  ;;  %2232 = vmatpush3.msra.mxu1 %v1569_v51 }
 0x202   : > { %2267 = vmatpush3.msra.mxu0 %v1601_v34  ;;  %2233 = vmatprep.subr.mxu1 %v1584_v46  ;;  %v1507_v14 = vunpack.c.0.s8 %v1506_v55  ;;  %v1645_v55 = vld [vmem:[%s3495_s5 + $0x2b8] sm:$0xff] }
 0x203   : > { %2268 = vmatprep.subr.mxu0 %v1616_v7  ;;  %2234 = vmatpush3.msra.mxu1 %v1568_v45 }
 0x204   : > { %2269 = vmatpush3.msra.mxu0 %v1600_v39  ;;  %2235 = vmatprep.subr.mxu1 %v1583_v35  ;;  %v1510_v7 = vsub.s32 %v1507_v14, %v2808_v27  ;;  %v1661_v14 = vld [vmem:[%s3495_s5 + $0x338] sm:$0xff]  ;;  %v2022_v27 = vld [vmem:[%s3497_s7 + $0x68] sm:$0xff] }
 0x205   : > { %2270 = vmatprep.subr.mxu0 %v1615_v49  ;;  %2236 = vmatpush3.msra.mxu1 %v1567_v47 }
 0x206   : > { %2271 = vmatpush3.msra.mxu0 %v1599_v40  ;;  %2237 = vmatprep.subr.mxu1 %v1582_v36 }
 0x207   : > { %2272 = vmatprep.subr.mxu0 %v1614_v8  ;;  %2238 = vmatpush3.msra.mxu1 %v1566_v11 }
 0x208   : > { %2273 = vmatpush3.msra.mxu0 %v1598_v59  ;;  %2239 = vmatprep.subr.mxu1 %v1581_v24 }
 0x209   : > { %2274 = vmatprep.subr.mxu0 %v1613_v15  ;;  %2240 = vmatpush3.msra.mxu1 %v1565_v32 }
 0x20a   : > { %2275 = vmatpush3.msra.mxu0 %v1597_v38  ;;  %2241 = vmatprep.subr.mxu1 %v1580_v60 }
 0x20b   : > { %2276 = vmatprep.subr.mxu0 %v1612_v29  ;;  %2242 = vmatpush3.msra.mxu1 %v1564_v6 }
 0x20c   : > { %2277 = vmatpush3.msra.mxu0 %v1596_v13  ;;  %2243 = vmatprep.subr.mxu1 %v1579_v41 }
 0x20d   : > { %2278 = vmatprep.subr.mxu0 %v1611_v50  ;;  %2244 = vmatpush3.msra.mxu1 %v1563_v43  ;;  %v1637_v43 = vld [vmem:[%s3495_s5 + $0x278] sm:$0xff] }
 0x20e   : > { %2279 = vmatpush3.msra.mxu0 %v1595_v42  ;;  %2245 = vmatprep.subr.mxu1 %v1578_v62  ;;  %v1636_v62 = vld [vmem:[%s3495_s5 + $0x270] sm:$0xff] }
 0x20f   : > { %2280 = vmatprep.subr.mxu0 %v1610_v1  ;;  %2246 = vmatpush3.msra.mxu1 %v1562_v53  ;;  %v1668_v1 = vld [vmem:[%s3495_s5 + $0x370] sm:$0xff]  ;;  %v1683_v53 = vld [vmem:[%s3495_s5 + $0x3e8] sm:$0xff] }
 0x210   : > { %2281 = vmatpush3.msra.mxu0 %v1594_v57  ;;  %2247 = vmatprep.subr.mxu1 %v1577_v28  ;;  %v1667_v57 = vld [vmem:[%s3495_s5 + $0x368] sm:$0xff]  ;;  %v1650_v28 = vld [vmem:[%s3495_s5 + $0x2e0] sm:$0xff] }
 0x211   : > { %2282 = vmatprep.subr.mxu0 %v1609_v37  ;;  %2248 = vmatpush3.msra.mxu1 %v1561_v44  ;;  %v1682_v37 = vld [vmem:[%s3495_s5 + $0x3e0] sm:$0xff] }
 0x212   : > { %2283 = vmatpush3.msra.mxu0 %v1593_v3  ;;  %2249 = vmatprep.subr.mxu1 %v1576_v63  ;;  %v1634_v44 = vld [vmem:[%s3495_s5 + $0x260] sm:$0xff]  ;;  %v1649_v63 = vld [vmem:[%s3495_s5 + $0x2d8] sm:$0xff] }
 0x213   : > { %2284 = vmatprep.subr.mxu0 %v1608_v26  ;;  %2250 = vmatpush3.msra.mxu1 %v1560_v0  ;;  %v1666_v3 = vld [vmem:[%s3495_s5 + $0x360] sm:$0xff]  ;;  %v1681_v26 = vld [vmem:[%s3495_s5 + $0x3d8] sm:$0xff] }
 0x214   : > { %2285 = vmatpush3.msra.mxu0 %v1592_v2  ;;  %2251 = vmatprep.subr.mxu1 %v1575_v61  ;;  %v1633_v0 = vld [vmem:[%s3495_s5 + $0x258] sm:$0xff]  ;;  %v1648_v61 = vld [vmem:[%s3495_s5 + $0x2d0] sm:$0xff] }
 0x215   : > { %2286 = vmatprep.subr.mxu0 %v1607_v21  ;;  %2252 = vmatpush3.msra.mxu1 %v1559_v5  ;;  %v1665_v2 = vld [vmem:[%s3495_s5 + $0x358] sm:$0xff]  ;;  %v1680_v21 = vld [vmem:[%s3495_s5 + $0x3d0] sm:$0xff] }
 0x216   : > { %2287 = vmatpush3.msra.mxu0 %v1591_v23  ;;  %2253 = vmatprep.subr.mxu1 %v1574_v9  ;;  %v1632_v5 = vld [vmem:[%s3495_s5 + $0x250] sm:$0xff]  ;;  %v1647_v9 = vld [vmem:[%s3495_s5 + $0x2c8] sm:$0xff] }
 0x217   : > { %2288 = vmatprep.subr.mxu0 %v1606_v52  ;;  %2254 = vmatpush3.msra.mxu1 %v1558_v12  ;;  %v1664_v23 = vld [vmem:[%s3495_s5 + $0x350] sm:$0xff]  ;;  %v1679_v52 = vld [vmem:[%s3495_s5 + $0x3c8] sm:$0xff] }
 0x218   : > { %2289 = vmatpush3.msra.mxu0 %v1590_v22  ;;  %2293 = vmatprep.subr.mxu1 %v1653_v25  ;;  %v1631_v12 = vld [vmem:[%s3495_s5 + $0x248] sm:$0xff]  ;;  %v1646_v25 = vld [vmem:[%s3495_s5 + $0x2c0] sm:$0xff] }
 0x219   : > { %2328 = vmatprep.subr.mxu0 %v1685_v4  ;;  %v1663_v22 = vld [vmem:[%s3495_s5 + $0x348] sm:$0xff]  ;;  %v1678_v4 = vld [vmem:[%s3495_s5 + $0x3c0] sm:$0xff] }
 0x28e   : > { %v1275_v48 = vpop.f32.mrf.mxu1 }
 0x290   : > { %v1277_v17 = vpop.f32.mrf.mxu1 }
 0x291   : > { %v1501_v46 = vcombine.low %v1275_v48, %v1277_v17  ;;  %v1630_v48 = vld [vmem:[%s3495_s5 + $0x240] sm:$0xff]  ;;  %v1629_v17 = vld [vmem:[%s3495_s5 + $0x238] sm:$0xff] }
 0x293   : > { %v1511_v49 = vrot.slane %v1501_v46, %v1510_v7  ;;  %v1628_v46 = vld [vmem:[%s3495_s5 + $0x230] sm:$0xff] }
 0x299   : > { %v1346_v30 = vpop.f32.mrf.mxu0 }
 0x29b   : > { %v1348_v51 = vpop.f32.mrf.mxu0 }
 0x29c   : > { %v1502_v45 = vcombine.low %v1346_v30, %v1348_v51  ;;  %v1677_v30 = vld [vmem:[%s3495_s5 + $0x3b8] sm:$0xff]  ;;  %v1644_v51 = vld [vmem:[%s3495_s5 + $0x2b0] sm:$0xff] }
 0x29e   : > { %v1518_v47 = vrot.slane %v1502_v45, %v1510_v7  ;;  %v1643_v45 = vld [vmem:[%s3495_s5 + $0x2a8] sm:$0xff] }
 0x2a0   : > { %v1533_v11 = vcombine.low %v1511_v49, %v1518_v47  ;;  %v1659_v49 = vld [vmem:[%s3495_s5 + $0x328] sm:$0xff]  ;;  %v1642_v47 = vld [vmem:[%s3495_s5 + $0x2a0] sm:$0xff] }
 0x2a2   : > { %v1541_v32 = vrot.slane %v1533_v11, %v1510_v7  ;;  %v1641_v11 = vld [vmem:[%s3495_s5 + $0x298] sm:$0xff] }
 0x2ae   : > { %v1417_v34 = vpop.f32.mrf.mxu1 }
 0x2b0   : > { %v1419_v39 = vpop.f32.mrf.mxu1 }
 0x2b1   : > { %v1503_v40 = vcombine.low %v1417_v34, %v1419_v39  ;;  %v1676_v34 = vld [vmem:[%s3495_s5 + $0x3b0] sm:$0xff]  ;;  %v1675_v39 = vld [vmem:[%s3495_s5 + $0x3a8] sm:$0xff] }
 0x2b3   : > { %v1525_v59 = vrot.slane %v1503_v40, %v1510_v7  ;;  %v1674_v40 = vld [vmem:[%s3495_s5 + $0x3a0] sm:$0xff] }
 0x2b9   : > { %v1488_v35 = vpop.f32.mrf.mxu0 }
 0x2bb   : > { %v1490_v36 = vpop.f32.mrf.mxu0 }
 0x2bc   : > { %v1504_v8 = vcombine.low %v1488_v35, %v1490_v36  ;;  %v1627_v35 = vld [vmem:[%s3495_s5 + $0x228] sm:$0xff]  ;;  %v1626_v36 = vld [vmem:[%s3495_s5 + $0x220] sm:$0xff] }
 0x2be   : > { %v1532_v24 = vrot.slane %v1504_v8, %v1510_v7  ;;  %v1658_v8 = vld [vmem:[%s3495_s5 + $0x320] sm:$0xff] }
 0x2c0   : > { %v1534_v15 = vcombine.low %v1525_v59, %v1532_v24  ;;  %v1673_v59 = vld [vmem:[%s3495_s5 + $0x398] sm:$0xff] }
 0x2c1   : > { %v1625_v24 = vld [vmem:[%s3495_s5 + $0x218] sm:$0xff] }
 0x2c2   : > { %v1548_v38 = vrot.slane %v1534_v15, %v1510_v7  ;;  %v1660_v7 = vld [vmem:[%s3495_s5 + $0x330] sm:$0xff]  ;;  %v1657_v15 = vld [vmem:[%s3495_s5 + $0x318] sm:$0xff] }
 0x2c4   : > { %v1549_v60 = vcombine.low %v1541_v32, %v1548_v38  ;;  %v1640_v32 = vld [vmem:[%s3495_s5 + $0x290] sm:$0xff] }
 0x2c5   : > { %v1672_v38 = vld [vmem:[%s3495_s5 + $0x390] sm:$0xff] }
 0x2c6   : > { %v3194_v29 = vmul.f32 0.015625, %v1549_v60  ;;  %v1624_v60 = vld [vmem:[%s3495_s5 + $0x210] sm:$0xff] }
 0x2c8   : > { %v1695_v6 = vrot.slane %v3194_v29, %v565_v31  ;;  %v1703_v13 = vrot.slane %v3194_v29, %v573_v58  ;;  %v1691_v41 = vrot.slane %v3194_v29, %v561_v33  ;;  %v1699_v50 = vrot.slane %v3194_v29, %v569_v54  ;;  %v1669_v31 = vld [vmem:[%s3495_s5 + $0x378] sm:$0xff]  ;;  %v1652_v58 = vld [vmem:[%s3495_s5 + $0x2f0] sm:$0xff] }
 0x2c9   : > { %v1711_v33 = vrot.slane %v3194_v29, %v581_v19  ;;  %v1684_v54 = vld [vmem:[%s3495_s5 + $0x3f0] sm:$0xff]  ;;  %v1719_v42 = vrot.slane %v3194_v29, %v589_v56  ;;  %v1651_v19 = vld [vmem:[%s3495_s5 + $0x2e8] sm:$0xff] }
 0x2ca   : > { %1792 = vmatprep.mubr.f32.mxu1 %v1695_v6  ;;  %1862 = vmatprep.mubr.f32.mxu0 %v1703_v13  ;;  %v1635_v56 = vld [vmem:[%s3495_s5 + $0x268] sm:$0xff]  ;;  %v1656_v6 = vld [vmem:[%s3495_s5 + $0x310] sm:$0xff] }
 0x2cb   : > { %1793 = vmatmul.mubr.f32.vlgmr.msra.gmra.mxu1 %v1691_v41  ;;  %1863 = vmatmul.mubr.f32.vlgmr.msra.gmra.mxu0 %v1699_v50  ;;  %v1639_v13 = vld [vmem:[%s3495_s5 + $0x288] sm:$0xff] }
 0x2cc   : > { %2294 = vmatpush3.msra.mxu1 %v1637_v43  ;;  %2329 = vmatpush3.msra.mxu0 %v1669_v31  ;;  %v1671_v41 = vld [vmem:[%s3495_s5 + $0x388] sm:$0xff]  ;;  %v1638_v31 = vld [vmem:[%s3495_s5 + $0x280] sm:$0xff] }
 0x2cd   : > { %2295 = vmatprep.subr.mxu1 %v1652_v58  ;;  %1932 = vmatprep.mubr.f32.mxu1 %v1711_v33  ;;  %v1623_v50 = vld [vmem:[%s3495_s5 + $0x208] sm:$0xff]  ;;  %v1670_v58 = vld [vmem:[%s3495_s5 + $0x380] sm:$0xff] }
 0x2ce   : > { %2330 = vmatprep.subr.mxu0 %v1684_v54  ;;  %2002 = vmatprep.mubr.f32.mxu0 %v1719_v42  ;;  %v1655_v43 = vld [vmem:[%s3495_s5 + $0x308] sm:$0xff]  ;;  %v1622_v33 = vld [vmem:[%s3495_s5 + $0x200] sm:$0xff]  ;;  %v1707_v42 = vrot.slane %v3194_v29, %v577_v10 }
 0x2cf   : > { %2296 = vmatpush3.msra.mxu1 %v1636_v62  ;;  %2331 = vmatpush3.msra.mxu0 %v1668_v1  ;;  %v1654_v54 = vld [vmem:[%s3495_s5 + $0x300] sm:$0xff]  ;;  %v1715_v62 = vrot.slane %v3194_v29, %v585_v16  ;;  %v2024_v1 = vld [vmem:[%s3497_s7 + $0x78] sm:$0xff]  ;;  %v2019_v29 = vld [vmem:[%s3497_s7 + $0x50] sm:$0xff] }
 0x2d0   : > { %2297 = vmatprep.subr.mxu1 %v1651_v19  ;;  %2332 = vmatprep.subr.mxu0 %v1683_v53  ;;  %v2023_v19 = vld [vmem:[%s3497_s7 + $0x70] sm:$0xff]  ;;  %v2021_v10 = vld [vmem:[%s3497_s7 + $0x60] sm:$0xff]  ;;  %v2020_v16 = vld [vmem:[%s3497_s7 + $0x58] sm:$0xff] }
 0x2d1   : > { %2298 = vmatpush3.msra.mxu1 %v1635_v56  ;;  %2333 = vmatpush3.msra.mxu0 %v1667_v57  ;;  %v2018_v53 = vld [vmem:[%s3497_s7 + $0x48] sm:$0xff]  ;;  %v2017_v56 = vld [vmem:[%s3497_s7 + $0x40] sm:$0xff]  ;;  %v2016_v57 = vld [vmem:[%s3497_s7 + $0x38] sm:$0xff] }
 0x2d2   : > { %2299 = vmatprep.subr.mxu1 %v1650_v28  ;;  %2334 = vmatprep.subr.mxu0 %v1682_v37  ;;  %v2015_v28 = vld [vmem:[%s3497_s7 + $0x30] sm:$0xff]  ;;  %v2014_v37 = vld [vmem:[%s3497_s7 + $0x28] sm:$0xff] }
 0x2d3   : > { %2300 = vmatpush3.msra.mxu1 %v1634_v44  ;;  %2335 = vmatpush3.msra.mxu0 %v1666_v3  ;;  %v2013_v44 = vld [vmem:[%s3497_s7 + $0x20] sm:$0xff]  ;;  %v2012_v3 = vld [vmem:[%s3497_s7 + $0x18] sm:$0xff] }
 0x2d4   : > { %2301 = vmatprep.subr.mxu1 %v1649_v63  ;;  %2336 = vmatprep.subr.mxu0 %v1681_v26  ;;  %v2011_v63 = vld [vmem:[%s3497_s7 + $0x10] sm:$0xff]  ;;  %v2010_v26 = vld [vmem:[%s3497_s7 + $0x8] sm:$0xff] }
 0x2d5   : > { %2302 = vmatpush3.msra.mxu1 %v1633_v0  ;;  %2337 = vmatpush3.msra.mxu0 %v1665_v2  ;;  %v2009_v0 = vld [vmem:[%s3497_s7] sm:$0xff] }
 0x2d6   : > { %2303 = vmatprep.subr.mxu1 %v1648_v61  ;;  %2338 = vmatprep.subr.mxu0 %v1680_v21 }
 0x2d7   : > { %2304 = vmatpush3.msra.mxu1 %v1632_v5  ;;  %2339 = vmatpush3.msra.mxu0 %v1664_v23  ;;  %v1686_v23 = vld [vmem:[%s3496_s6] sm:$0x1] }
 0x2d8   : > { %2305 = vmatprep.subr.mxu1 %v1647_v9  ;;  %2340 = vmatprep.subr.mxu0 %v1679_v52 }
 0x2d9   : > { %2306 = vmatpush3.msra.mxu1 %v1631_v12  ;;  %2341 = vmatpush3.msra.mxu0 %v1663_v22 }
 0x2da   : > { %2307 = vmatprep.subr.mxu1 %v1646_v25  ;;  %2342 = vmatprep.subr.mxu0 %v1678_v4 }
 0x2db   : > { %2308 = vmatpush3.msra.mxu1 %v1630_v48  ;;  %2343 = vmatpush3.msra.mxu0 %v1662_v20 }
 0x2dc   : > { %2309 = vmatprep.subr.mxu1 %v1645_v55  ;;  %2344 = vmatprep.subr.mxu0 %v1677_v30 }
 0x2dd   : > { %2310 = vmatpush3.msra.mxu1 %v1629_v17  ;;  %2345 = vmatpush3.msra.mxu0 %v1661_v14 }
 0x2de   : > { %2311 = vmatprep.subr.mxu1 %v1644_v51  ;;  %2346 = vmatprep.subr.mxu0 %v1676_v34  ;;  %v2025_v51 = vld [vmem:[%s3498_s8] sm:$0x1] }
 0x2df   : > { %2312 = vmatpush3.msra.mxu1 %v1628_v46  ;;  %2347 = vmatpush3.msra.mxu0 %v1660_v7 }
 0x2e0   : > { %2313 = vmatprep.subr.mxu1 %v1643_v45  ;;  %2348 = vmatprep.subr.mxu0 %v1675_v39 }
 0x2e1   : > { %2314 = vmatpush3.msra.mxu1 %v1627_v35  ;;  %2349 = vmatpush3.msra.mxu0 %v1659_v49 }
 0x2e2   : > { %2315 = vmatprep.subr.mxu1 %v1642_v47  ;;  %2350 = vmatprep.subr.mxu0 %v1674_v40 }
 0x2e3   : > { %2316 = vmatpush3.msra.mxu1 %v1626_v36  ;;  %2351 = vmatpush3.msra.mxu0 %v1658_v8 }
 0x2e4   : > { %2317 = vmatprep.subr.mxu1 %v1641_v11  ;;  %2352 = vmatprep.subr.mxu0 %v1673_v59 }
 0x2e5   : > { %2318 = vmatpush3.msra.mxu1 %v1625_v24  ;;  %2353 = vmatpush3.msra.mxu0 %v1657_v15 }
 0x2e6   : > { %2319 = vmatprep.subr.mxu1 %v1640_v32  ;;  %2354 = vmatprep.subr.mxu0 %v1672_v38 }
 0x2e7   : > { %2320 = vmatpush3.msra.mxu1 %v1624_v60  ;;  %2355 = vmatpush3.msra.mxu0 %v1656_v6 }
 0x2e8   : > { %2321 = vmatprep.subr.mxu1 %v1639_v13  ;;  %2356 = vmatprep.subr.mxu0 %v1671_v41 }
 0x2e9   : > { %2322 = vmatpush3.msra.mxu1 %v1623_v50  ;;  %2357 = vmatpush3.msra.mxu0 %v1655_v43 }
 0x2ea   : > { %2323 = vmatprep.subr.mxu1 %v1638_v31  ;;  %2358 = vmatprep.subr.mxu0 %v1670_v58 }
 0x2eb   : > { %2324 = vmatpush3.msra.mxu1 %v1622_v33  ;;  %2359 = vmatpush3.msra.mxu0 %v1654_v54 }
 0x2ec   : > { %1933 = vmatmul.mubr.f32.vlgmr.msra.gmra.mxu1 %v1707_v42  ;;  %2003 = vmatmul.mubr.f32.vlgmr.msra.gmra.mxu0 %v1715_v62 }
 0x2ed   : > { %2396 = vmatprep.subr.mxu1 %v2491_v18  ;;  %2428 = vmatprep.mubr.msk.f32.mxu1 %vm2494_vm3, %v2491_v18 }
 0x2ee   : > { %2397 = vmatpush3.msra.mxu1 %v2024_v1 }
 0x2ef   : > { %2398 = vmatprep.subr.mxu1 %v2491_v18 }
 0x2f0   : > { %2399 = vmatpush3.msra.mxu1 %v2023_v19 }
 0x2f1   : > { %2400 = vmatprep.subr.mxu1 %v2491_v18 }
 0x2f2   : > { %2401 = vmatpush3.msra.mxu1 %v2022_v27 }
 0x2f3   : > { %2402 = vmatprep.subr.mxu1 %v2491_v18 }
 0x2f4   : > { %2403 = vmatpush3.msra.mxu1 %v2021_v10 }
 0x2f5   : > { %2404 = vmatprep.subr.mxu1 %v2491_v18 }
 0x2f6   : > { %2405 = vmatpush3.msra.mxu1 %v2020_v16 }
 0x2f7   : > { %2406 = vmatprep.subr.mxu1 %v2491_v18 }
 0x2f8   : > { %2407 = vmatpush3.msra.mxu1 %v2019_v29 }
 0x2f9   : > { %2408 = vmatprep.subr.mxu1 %v2491_v18 }
 0x2fa   : > { %2409 = vmatpush3.msra.mxu1 %v2018_v53 }
 0x2fb   : > { %2410 = vmatprep.subr.mxu1 %v2491_v18 }
 0x2fc   : > { %2411 = vmatpush3.msra.mxu1 %v2017_v56 }
 0x2fd   : > { %2412 = vmatprep.subr.mxu1 %v2491_v18 }
 0x2fe   : > { %2413 = vmatpush3.msra.mxu1 %v2016_v57 }
 0x2ff   : > { %2414 = vmatprep.subr.mxu1 %v2491_v18 }
 0x300   : > { %2415 = vmatpush3.msra.mxu1 %v2015_v28 }
 0x301   : > { %2416 = vmatprep.subr.mxu1 %v2491_v18 }
 0x302   : > { %2417 = vmatpush3.msra.mxu1 %v2014_v37 }
 0x303   : > { %2418 = vmatprep.subr.mxu1 %v2491_v18 }
 0x304   : > { %2419 = vmatpush3.msra.mxu1 %v2013_v44 }
 0x305   : > { %2420 = vmatprep.subr.mxu1 %v2491_v18 }
 0x306   : > { %2421 = vmatpush3.msra.mxu1 %v2012_v3 }
 0x307   : > { %2422 = vmatprep.subr.mxu1 %v2491_v18 }
 0x308   : > { %2423 = vmatpush3.msra.mxu1 %v2011_v63 }
 0x309   : > { %2424 = vmatprep.subr.mxu1 %v2491_v18 }
 0x30a   : > { %2425 = vmatpush3.msra.mxu1 %v2010_v26 }
 0x30b   : > { %2426 = vmatprep.subr.mxu1 %v2491_v18 }
 0x30c   : > { %2427 = vmatpush3.msra.mxu1 %v2009_v0 }
 0x38b   : > { %v2255_v2 = vpop.f32.mrf.mxu1  ;;  %v2290_v21 = vpop.f32.mrf.mxu0 }
 0x38d   : > { %v2256_v61 = vpop.f32.mrf.mxu1  ;;  %v2291_v9 = vpop.f32.mrf.mxu0 }
 0x38e   : > { %v2257_v5 = vadd.f32 %v2256_v61, %v2255_v2  ;;  %v2292_v25 = vadd.f32 %v2291_v9, %v2290_v21 }
 0x390   : > { %v1795_v52 = vadd.f32 %v2257_v5, %v1686_v23 }
 0x392   : > { %v1865_v20 = vadd.f32 %v2292_v25, %v1795_v52 }
 0x3ac   : > { %v2325_v12 = vpop.f32.mrf.mxu1  ;;  %v2360_v22 = vpop.f32.mrf.mxu0 }
 0x3ae   : > { %v2326_v4 = vpop.f32.mrf.mxu1  ;;  %v2361_v48 = vpop.f32.mrf.mxu0 }
 0x3af   : > { %v2327_v55 = vadd.f32 %v2326_v4, %v2325_v12  ;;  %v2362_v18 = vadd.f32 %v2361_v48, %v2360_v22 }
 0x3b1   : > { %v1935_v30 = vadd.f32 %v2327_v55, %v1865_v20 }
 0x3b3   : > { %v2005_v17 = vadd.f32 %v2362_v18, %v1935_v30 }
 0x3b5   : > { %v2008_v14 = vmax.f32 %v2005_v17, 0.0 }
 0x3b7   : > { %2429 = vmatmul.mubr.f32.vlgmr.msra.gmra.mxu1 %v2008_v14 }
 0x477   : > { %v2092_v34 = vpop.f32.mrf.mxu1 }
 0x478   : > { %v2093_v46 = vadd.f32 %v2092_v34, %v2025_v51 }
 0x479   : > { %v2430_v7 = vpop.f32.mrf.mxu1 }
 0x47a   : > { %2096 = vst [vmem:[%s356_s26] sm:$0x1] %v2093_v46 }
 0x47b PF: > { %s19_s11 = sadd.s32 1, %s2489_s11   ;;  %s3500_s30 = smov %s2485_s10 }
 0x47c   : > { %p16_p5 = scmp.ge.s32.totalorder %s19_s11, 4   ;;  %s3501_s10 = smov %s3503_s12 }
 0x47e   :  { %18 = sbr.rel (!%p16_p5) target bundleno = 2 (0x2), region = 94 }

</bundles_post_ra>
